<compile_context>
chip_gen: v5e
topology: v5e:2x2
jax: 0.10.0
libtpu: 0.0.40
codegen_flags: <defaults>
</compile_context>

<pallas_src>
import functools

import numpy as np
import jax
import jax.numpy as jnp
from jax.experimental import pallas as pl
from jax.experimental.pallas import tpu as pltpu

_EPS = 1e-7

# misc slab row layout
_ROW_PB = 0    # pred  box: x, y, w, h, r   (rows 0..4)
_ROW_TB = 5    # target box: x, y, w, h, r  (rows 5..9)
_ROW_AN = 10   # anchor: x, y               (rows 10..11)
_ROW_WF = 12   # weight * fg                (row 12)
_MISC_ROWS = 16  # padded to a multiple of 8 sublanes


def _rotated_bbox_loss_kernel(pd_ref, misc_ref, iou_out_ref, dfl_out_ref,
                              acc_ref, *, bf16_exp: bool):
    i = pl.program_id(0)
    nsteps = pl.num_programs(0)
    reg_max = pd_ref.shape[0] // 4

    @pl.when(i == 0)
    def _init():
        acc_ref[...] = jnp.zeros_like(acc_ref)

    # ---- unpack the small-feature slab (sublane slices are cheap) ----
    px = misc_ref[_ROW_PB + 0:_ROW_PB + 1, :]
    py = misc_ref[_ROW_PB + 1:_ROW_PB + 2, :]
    pw = misc_ref[_ROW_PB + 2:_ROW_PB + 3, :]
    ph = misc_ref[_ROW_PB + 3:_ROW_PB + 4, :]
    pr = misc_ref[_ROW_PB + 4:_ROW_PB + 5, :]
    tx = misc_ref[_ROW_TB + 0:_ROW_TB + 1, :]
    ty = misc_ref[_ROW_TB + 1:_ROW_TB + 2, :]
    tw = misc_ref[_ROW_TB + 2:_ROW_TB + 3, :]
    th = misc_ref[_ROW_TB + 3:_ROW_TB + 4, :]
    trr = misc_ref[_ROW_TB + 4:_ROW_TB + 5, :]
    ax = misc_ref[_ROW_AN + 0:_ROW_AN + 1, :]
    ay = misc_ref[_ROW_AN + 1:_ROW_AN + 2, :]
    wfg = misc_ref[_ROW_WF:_ROW_WF + 1, :]          # target_scores.sum(-1) * fg

    # ---------------- probiou ----------------
    def cov(w, h, r):
        a = w * w * (1.0 / 12.0)
        b = h * h * (1.0 / 12.0)
        c = jnp.cos(r)
        s = jnp.sin(r)
        return a * c * c + b * s * s, a * s * s + b * c * c, (a - b) * c * s

    a1, b1, c1 = cov(pw, ph, pr)
    a2, b2, c2 = cov(tw, th, trr)
    dx = px - tx
    dy = py - ty
    denom = (a1 + a2) * (b1 + b2) - (c1 + c2) * (c1 + c2)
    inv = pl.reciprocal(denom + _EPS, approx=True)   # one EUP recip, two VALU muls
    t1 = ((a1 + a2) * dy * dy + (b1 + b2) * dx * dx) * inv * 0.25
    t2 = ((c1 + c2) * (-dx) * dy) * inv * 0.5
    det1 = jnp.maximum(a1 * b1 - c1 * c1, 0.0)
    det2 = jnp.maximum(a2 * b2 - c2 * c2, 0.0)
    t3 = jnp.log(denom / (4.0 * jnp.sqrt(det1 * det2) + _EPS) + _EPS) * 0.5
    bd = jnp.clip(t1 + t2 + t3, _EPS, 100.0)
    hd = jnp.sqrt(1.0 - jnp.exp(-bd) + _EPS)         # == (1 - iou)
    acc_ref[0:1, :] += hd * wfg                      # ((1-iou) * weight) masked

    # ------- DFL: bbox2dist(anchor, xywh2xyxy(target[..., :4]), reg_max-1) -------
    x1 = tx - tw * 0.5
    y1 = ty - th * 0.5
    x2 = tx + tw * 0.5
    y2 = ty + th * 0.5
    hi = float(reg_max - 1) - 0.01
    ltrb = (ax - x1, ay - y1, x2 - ax, y2 - ay)

    dfl = jnp.zeros_like(wfg)
    for d in range(4):
        t = jnp.clip(ltrb[d], 0.0, hi)
        tl = jnp.floor(t)
        wl = tl + 1.0 - t
        wr = 1.0 - wl
        tl_i = tl.astype(jnp.int32)
        logits = pd_ref[d * reg_max:(d + 1) * reg_max, :]       # (reg_max, TN)
        m = jnp.max(logits, axis=0, keepdims=True)
        sh = logits - m
        if bf16_exp:
            ex = jnp.exp(sh.astype(jnp.bfloat16)).astype(jnp.float32)
        else:
            ex = jnp.exp(sh)
        lse = jnp.log(jnp.sum(ex, axis=0, keepdims=True)) + m
        idx = jax.lax.broadcasted_iota(jnp.int32, logits.shape, 0)
        # wl + wr == 1  =>  (lse-pick_l)*wl + (lse-pick_r)*wr == lse - sum(sel*logits)
        sel = jnp.where(idx == tl_i, wl, 0.0) + jnp.where(idx == tl_i + 1, wr, 0.0)
        pick = jnp.sum(sel * logits, axis=0, keepdims=True)
        dfl = dfl + (lse - pick)
    acc_ref[1:2, :] += dfl * (0.25 * wfg)            # .mean(-1) * weight, masked

    # one cross-lane reduce + SMEM store, only on the final grid step
    @pl.when(i == nsteps - 1)
    def _finalize():
        iou_out_ref[0, 0] = jnp.sum(acc_ref[0:1, :])
        dfl_out_ref[0, 0] = jnp.sum(acc_ref[1:2, :])


def rotated_bbox_loss(pred_dist, pred_bboxes, anchor_points, target_bboxes,
                      target_scores, target_scores_sum, fg_mask,
                      reg_max=16, tile_n=2048, bf16_exp=True):
    """Pallas implementation of RotatedBboxLoss.forward (no learnable params)."""
    B, A, c4 = pred_dist.shape
    assert c4 == 4 * reg_max
    N = B * A

    # lane tiling: big tiles, but never larger than the (128-padded) problem
    n128 = ((N + 127) // 128) * 128
    tile = max(128, min(((tile_n + 127) // 128) * 128, n128))
    Np = ((n128 + tile - 1) // tile) * tile
    grid = Np // tile

    f32 = jnp.float32

    # big input: DFL logits, feature-major (4*reg_max, Np)
    pd_t = jnp.pad(pred_dist.reshape(N, 4 * reg_max).astype(f32).T,
                   ((0, 0), (0, Np - N)))

    # small per-anchor rows, fused into one 16-row slab (one DMA per step)
    wfg = (target_scores.astype(f32).sum(-1) * fg_mask.astype(f32)).reshape(1, N)
    an_rows = jnp.tile(anchor_points.astype(f32).T, (1, B))        # (2, N)
    misc = jnp.concatenate([
        pred_bboxes.reshape(N, 5).astype(f32).T,                   # rows 0..4
        target_bboxes.reshape(N, 5).astype(f32).T,                 # rows 5..9
        an_rows,                                                   # rows 10..11
        wfg,                                                       # row 12
    ], axis=0)                                                     # (13, N)
    misc = jnp.pad(misc, ((0, _MISC_ROWS - misc.shape[0]), (0, Np - N)))

    kernel = functools.partial(_rotated_bbox_loss_kernel, bf16_exp=bf16_exp)

    iou_sum, dfl_sum = pl.pallas_call(
        kernel,
        out_shape=(jax.ShapeDtypeStruct((1, 1), f32),
                   jax.ShapeDtypeStruct((1, 1), f32)),
        grid=(grid,),
        in_specs=[
            pl.BlockSpec((4 * reg_max, tile), lambda i: (0, i)),
            pl.BlockSpec((_MISC_ROWS, tile), lambda i: (0, i)),
        ],
        out_specs=(pl.BlockSpec(memory_space=pltpu.MemorySpace.SMEM),
                   pl.BlockSpec(memory_space=pltpu.MemorySpace.SMEM)),
        scratch_shapes=[pltpu.VMEM((2, tile), f32)],   # per-lane partial sums
        compiler_params=pltpu.CompilerParams(
            dimension_semantics=("arbitrary",),        # sequential accumulation
            vmem_limit_bytes=32 * 1024 * 1024),
    )(pd_t, misc)

    tss = jnp.asarray(target_scores_sum, f32)
    return iou_sum[0, 0] / tss, dfl_sum[0, 0] / tss


# ----------------------- numpy reference (PyTorch semantics) -----------------------
def _ref_rotated_bbox_loss(pred_dist, pred_bboxes, anchor_points, target_bboxes,
                           target_scores, target_scores_sum, fg_mask, reg_max):
    eps = 1e-7
    pd = np.asarray(pred_dist, np.float64)
    pb = np.asarray(pred_bboxes, np.float64)
    tb = np.asarray(target_bboxes, np.float64)
    ap = np.asarray(anchor_points, np.float64)
    ts = np.asarray(target_scores, np.float64)
    fg = np.asarray(fg_mask, bool)
    tss = float(target_scores_sum)

    weight = ts.sum(-1)[fg][:, None]
    p, t = pb[fg], tb[fg]

    def cov(b):
        a = b[:, 2] ** 2 / 12.0
        bb = b[:, 3] ** 2 / 12.0
        c = b[:, 4]
        cs, sn = np.cos(c), np.sin(c)
        return a * cs ** 2 + bb * sn ** 2, a * sn ** 2 + bb * cs ** 2, (a - bb) * cs * sn

    x1, y1_, x2, y2_ = p[:, 0], p[:, 1], t[:, 0], t[:, 1]
    a1, b1, c1 = cov(p)
    a2, b2, c2 = cov(t)
    denom = (a1 + a2) * (b1 + b2) - (c1 + c2) ** 2
    t1 = ((a1 + a2) * (y1_ - y2_) ** 2 + (b1 + b2) * (x1 - x2) ** 2) / (denom + eps) * 0.25
    t2 = ((c1 + c2) * (x2 - x1) * (y1_ - y2_)) / (denom + eps) * 0.5
    t3 = np.log(denom / (4.0 * np.sqrt(np.clip(a1 * b1 - c1 ** 2, 0, None)
                                       * np.clip(a2 * b2 - c2 ** 2, 0, None)) + eps) + eps) * 0.5
    bd = np.clip(t1 + t2 + t3, eps, 100.0)
    iou = 1.0 - np.sqrt(1.0 - np.exp(-bd) + eps)
    loss_iou = ((1.0 - iou)[:, None] * weight).sum() / tss

    xy, wh = tb[..., :2], tb[..., 2:4]
    x1y1, x2y2 = xy - wh / 2.0, xy + wh / 2.0
    ltrb = np.clip(np.concatenate([ap[None] - x1y1, x2y2 - ap[None]], -1),
                   0.0, reg_max - 1 - 0.01)
    tgt = np.clip(ltrb[fg], 0.0, reg_max - 1 - 0.01)           # (Nfg, 4)
    logits = pd[fg].reshape(-1, reg_max)                       # (Nfg*4, reg_max)
    tl = tgt.astype(np.int64)
    tr = tl + 1
    wl = tr - tgt
    wr = 1.0 - wl
    mx = logits.max(-1, keepdims=True)
    lse = np.log(np.exp(logits - mx).sum(-1)) + mx[:, 0]

    def ce(idx):
        return (lse - logits[np.arange(logits.shape[0]), idx.reshape(-1)]).reshape(tgt.shape)

    dfl = (ce(tl) * wl + ce(tr) * wr).mean(-1, keepdims=True)
    loss_dfl = (dfl * weight).sum() / tss
    return loss_iou, loss_dfl


def _make_inputs(seed, B, A, reg_max, nc):
    ks = jax.random.split(jax.random.PRNGKey(seed), 8)
    pred_dist = jax.random.normal(ks[0], (B, A, 4 * reg_max), jnp.float32)
    anchor_points = jax.random.uniform(ks[1], (A, 2), jnp.float32, 2.0, 14.0)
    pred_bboxes = jnp.concatenate([
        jax.random.uniform(ks[2], (B, A, 2), jnp.float32, 2.0, 14.0),
        jax.random.uniform(ks[3], (B, A, 2), jnp.float32, 1.0, 6.0),
        jax.random.uniform(ks[4], (B, A, 1), jnp.float32, -0.7, 0.7)], -1)
    target_bboxes = jnp.concatenate([
        jax.random.uniform(ks[5], (B, A, 2), jnp.float32, 2.0, 14.0),
        jax.random.uniform(ks[6], (B, A, 2), jnp.float32, 1.0, 6.0),
        jax.random.uniform(ks[7], (B, A, 1), jnp.float32, -0.7, 0.7)], -1)
    k2 = jax.random.split(jax.random.PRNGKey(seed + 1), 2)
    target_scores = jax.random.uniform(k2[0], (B, A, nc), jnp.float32)
    fg_mask = jax.random.bernoulli(k2[1], 0.5, (B, A))
    target_scores_sum = jnp.maximum(target_scores.sum(), 1.0)
    return (pred_dist, pred_bboxes, anchor_points, target_bboxes,
            target_scores, target_scores_sum, fg_mask)


if __name__ == "__main__":
    reg_max, nc = 16, 4

    # case 1: small problem, single grid step
    args = _make_inputs(0, B=2, A=128, reg_max=reg_max, nc=nc)
    loss_iou, loss_dfl = rotated_bbox_loss(*args, reg_max=reg_max)
    jax.block_until_ready((loss_iou, loss_dfl))
    ref_iou, ref_dfl = _ref_rotated_bbox_loss(*args, reg_max=reg_max)
    np.testing.assert_allclose(float(loss_iou), ref_iou, rtol=2e-3, atol=1e-3)
    np.testing.assert_allclose(float(loss_dfl), ref_dfl, rtol=2e-3, atol=1e-3)

    # case 2: multi-tile grid (exercises the VMEM accumulator across steps)
    args2 = _make_inputs(2, B=2, A=640, reg_max=reg_max, nc=nc)
    loss_iou2, loss_dfl2 = rotated_bbox_loss(*args2, reg_max=reg_max, tile_n=512)
    jax.block_until_ready((loss_iou2, loss_dfl2))
    ref_iou2, ref_dfl2 = _ref_rotated_bbox_loss(*args2, reg_max=reg_max)
    np.testing.assert_allclose(float(loss_iou2), ref_iou2, rtol=2e-3, atol=1e-3)
    np.testing.assert_allclose(float(loss_dfl2), ref_dfl2, rtol=2e-3, atol=1e-3)

    print("KERNEL_OK")
</pallas_src>

<mosaic_0001>
module attributes {stable_mosaic.version = 11 : i64} {
  func.func @_rotated_bbox_loss_kernel(%arg0: i32, %arg1: memref<64x256xf32, #tpu.memory_space<vmem>>, %arg2: memref<16x256xf32, #tpu.memory_space<vmem>>, %arg3: memref<1x1xf32, #tpu.memory_space<smem>>, %arg4: memref<1x1xf32, #tpu.memory_space<smem>>, %arg5: memref<2x256xf32, #tpu.memory_space<vmem>>) attributes {dimension_semantics = [#tpu.dimension_semantics<arbitrary>], iteration_bounds = array<i64: 1>, scalar_prefetch = 0 : i64, scratch_operands = 1 : i64, tpu.core_type = #tpu.core_type<tc>, window_params = [{transform_indices = @transform_0, window_bounds = array<i64: 64, 256>}, {transform_indices = @transform_1, window_bounds = array<i64: 16, 256>}, {transform_indices = @transform_2, window_bounds = array<i64: 1, 1>}, {transform_indices = @transform_3, window_bounds = array<i64: 1, 1>}]} {
    %c0_i32 = arith.constant 0 : i32
    %0 = arith.cmpi eq, %arg0, %c0_i32 : i32
    %1 = arith.extui %0 : i1 to i32
    %c0_i32_0 = arith.constant 0 : i32
    %2 = arith.cmpi ne, %1, %c0_i32_0 : i32
    scf.if %2 {
      %cst_92 = arith.constant 0.000000e+00 : f32
      %330 = vector.broadcast %cst_92 : f32 to vector<2x256xf32>
      %c0_93 = arith.constant 0 : index
      %c0_94 = arith.constant 0 : index
      %331 = vector.load %arg5[%c0_93, %c0_94] : memref<2x256xf32, #tpu.memory_space<vmem>>, vector<2x256xf32>
      tpu.vector_store %arg5[%c0_93, %c0_94], %330 {strides = array<i32>} : memref<2x256xf32, #tpu.memory_space<vmem>>, vector<2x256xf32>,
    } else {
    }
    %c0 = arith.constant 0 : index
    %c0_1 = arith.constant 0 : index
    %3 = vector.load %arg2[%c0, %c0_1] : memref<16x256xf32, #tpu.memory_space<vmem>>, vector<1x256xf32>
    %c1 = arith.constant 1 : index
    %c0_2 = arith.constant 0 : index
    %4 = vector.load %arg2[%c1, %c0_2] : memref<16x256xf32, #tpu.memory_space<vmem>>, vector<1x256xf32>
    %c2 = arith.constant 2 : index
    %c0_3 = arith.constant 0 : index
    %5 = vector.load %arg2[%c2, %c0_3] : memref<16x256xf32, #tpu.memory_space<vmem>>, vector<1x256xf32>
    %c3 = arith.constant 3 : index
    %c0_4 = arith.constant 0 : index
    %6 = vector.load %arg2[%c3, %c0_4] : memref<16x256xf32, #tpu.memory_space<vmem>>, vector<1x256xf32>
    %c4 = arith.constant 4 : index
    %c0_5 = arith.constant 0 : index
    %7 = vector.load %arg2[%c4, %c0_5] : memref<16x256xf32, #tpu.memory_space<vmem>>, vector<1x256xf32>
    %c5 = arith.constant 5 : index
    %c0_6 = arith.constant 0 : index
    %8 = vector.load %arg2[%c5, %c0_6] : memref<16x256xf32, #tpu.memory_space<vmem>>, vector<1x256xf32>
    %c6 = arith.constant 6 : index
    %c0_7 = arith.constant 0 : index
    %9 = vector.load %arg2[%c6, %c0_7] : memref<16x256xf32, #tpu.memory_space<vmem>>, vector<1x256xf32>
    %c7 = arith.constant 7 : index
    %c0_8 = arith.constant 0 : index
    %10 = vector.load %arg2[%c7, %c0_8] : memref<16x256xf32, #tpu.memory_space<vmem>>, vector<1x256xf32>
    %c8 = arith.constant 8 : index
    %c0_9 = arith.constant 0 : index
    %11 = vector.load %arg2[%c8, %c0_9] : memref<16x256xf32, #tpu.memory_space<vmem>>, vector<1x256xf32>
    %c9 = arith.constant 9 : index
    %c0_10 = arith.constant 0 : index
    %12 = vector.load %arg2[%c9, %c0_10] : memref<16x256xf32, #tpu.memory_space<vmem>>, vector<1x256xf32>
    %c10 = arith.constant 10 : index
    %c0_11 = arith.constant 0 : index
    %13 = vector.load %arg2[%c10, %c0_11] : memref<16x256xf32, #tpu.memory_space<vmem>>, vector<1x256xf32>
    %c11 = arith.constant 11 : index
    %c0_12 = arith.constant 0 : index
    %14 = vector.load %arg2[%c11, %c0_12] : memref<16x256xf32, #tpu.memory_space<vmem>>, vector<1x256xf32>
    %c12 = arith.constant 12 : index
    %c0_13 = arith.constant 0 : index
    %15 = vector.load %arg2[%c12, %c0_13] : memref<16x256xf32, #tpu.memory_space<vmem>>, vector<1x256xf32>
    %16 = arith.mulf %5, %5 : vector<1x256xf32>
    %cst = arith.constant 0.0833333358 : f32
    %17 = vector.broadcast %cst : f32 to vector<1x256xf32>
    %18 = arith.mulf %16, %17 : vector<1x256xf32>
    %19 = arith.mulf %6, %6 : vector<1x256xf32>
    %cst_14 = arith.constant 0.0833333358 : f32
    %20 = vector.broadcast %cst_14 : f32 to vector<1x256xf32>
    %21 = arith.mulf %19, %20 : vector<1x256xf32>
    %22 = math.cos %7 : vector<1x256xf32>
    %23 = math.sin %7 : vector<1x256xf32>
    %24 = arith.mulf %18, %22 : vector<1x256xf32>
    %25 = arith.mulf %24, %22 : vector<1x256xf32>
    %26 = arith.mulf %21, %23 : vector<1x256xf32>
    %27 = arith.mulf %26, %23 : vector<1x256xf32>
    %28 = arith.addf %25, %27 : vector<1x256xf32>
    %29 = arith.mulf %18, %23 : vector<1x256xf32>
    %30 = arith.mulf %29, %23 : vector<1x256xf32>
    %31 = arith.mulf %21, %22 : vector<1x256xf32>
    %32 = arith.mulf %31, %22 : vector<1x256xf32>
    %33 = arith.addf %30, %32 : vector<1x256xf32>
    %34 = arith.subf %18, %21 : vector<1x256xf32>
    %35 = arith.mulf %34, %22 : vector<1x256xf32>
    %36 = arith.mulf %35, %23 : vector<1x256xf32>
    %37 = arith.mulf %10, %10 : vector<1x256xf32>
    %cst_15 = arith.constant 0.0833333358 : f32
    %38 = vector.broadcast %cst_15 : f32 to vector<1x256xf32>
    %39 = arith.mulf %37, %38 : vector<1x256xf32>
    %40 = arith.mulf %11, %11 : vector<1x256xf32>
    %cst_16 = arith.constant 0.0833333358 : f32
    %41 = vector.broadcast %cst_16 : f32 to vector<1x256xf32>
    %42 = arith.mulf %40, %41 : vector<1x256xf32>
    %43 = math.cos %12 : vector<1x256xf32>
    %44 = math.sin %12 : vector<1x256xf32>
    %45 = arith.mulf %39, %43 : vector<1x256xf32>
    %46 = arith.mulf %45, %43 : vector<1x256xf32>
    %47 = arith.mulf %42, %44 : vector<1x256xf32>
    %48 = arith.mulf %47, %44 : vector<1x256xf32>
    %49 = arith.addf %46, %48 : vector<1x256xf32>
    %50 = arith.mulf %39, %44 : vector<1x256xf32>
    %51 = arith.mulf %50, %44 : vector<1x256xf32>
    %52 = arith.mulf %42, %43 : vector<1x256xf32>
    %53 = arith.mulf %52, %43 : vector<1x256xf32>
    %54 = arith.addf %51, %53 : vector<1x256xf32>
    %55 = arith.subf %39, %42 : vector<1x256xf32>
    %56 = arith.mulf %55, %43 : vector<1x256xf32>
    %57 = arith.mulf %56, %44 : vector<1x256xf32>
    %58 = arith.subf %3, %8 : vector<1x256xf32>
    %59 = arith.subf %4, %9 : vector<1x256xf32>
    %60 = arith.addf %28, %49 : vector<1x256xf32>
    %61 = arith.addf %33, %54 : vector<1x256xf32>
    %62 = arith.mulf %60, %61 : vector<1x256xf32>
    %63 = arith.addf %36, %57 : vector<1x256xf32>
    %64 = arith.addf %36, %57 : vector<1x256xf32>
    %65 = arith.mulf %63, %64 : vector<1x256xf32>
    %66 = arith.subf %62, %65 : vector<1x256xf32>
    %cst_17 = arith.constant 1.000000e-07 : f32
    %67 = vector.broadcast %cst_17 : f32 to vector<1x256xf32>
    %68 = arith.addf %66, %67 : vector<1x256xf32>
    %69 = tpu.reciprocal %68 {approx = true} : vector<1x256xf32> -> vector<1x256xf32>
    %70 = arith.addf %28, %49 : vector<1x256xf32>
    %71 = arith.mulf %70, %59 : vector<1x256xf32>
    %72 = arith.mulf %71, %59 : vector<1x256xf32>
    %73 = arith.addf %33, %54 : vector<1x256xf32>
    %74 = arith.mulf %73, %58 : vector<1x256xf32>
    %75 = arith.mulf %74, %58 : vector<1x256xf32>
    %76 = arith.addf %72, %75 : vector<1x256xf32>
    %77 = arith.mulf %76, %69 : vector<1x256xf32>
    %cst_18 = arith.constant 2.500000e-01 : f32
    %78 = vector.broadcast %cst_18 : f32 to vector<1x256xf32>
    %79 = arith.mulf %77, %78 : vector<1x256xf32>
    %80 = arith.addf %36, %57 : vector<1x256xf32>
    %cst_19 = arith.constant 0.000000e+00 : f32
    %81 = vector.broadcast %cst_19 : f32 to vector<1x256xf32>
    %82 = arith.subf %81, %58 : vector<1x256xf32>
    %83 = arith.mulf %80, %82 : vector<1x256xf32>
    %84 = arith.mulf %83, %59 : vector<1x256xf32>
    %85 = arith.mulf %84, %69 : vector<1x256xf32>
    %cst_20 = arith.constant 5.000000e-01 : f32
    %86 = vector.broadcast %cst_20 : f32 to vector<1x256xf32>
    %87 = arith.mulf %85, %86 : vector<1x256xf32>
    %88 = arith.mulf %28, %33 : vector<1x256xf32>
    %89 = arith.mulf %36, %36 : vector<1x256xf32>
    %90 = arith.subf %88, %89 : vector<1x256xf32>
    %cst_21 = arith.constant 0.000000e+00 : f32
    %91 = vector.broadcast %cst_21 : f32 to vector<1x256xf32>
    %92 = arith.maximumf %90, %91 : vector<1x256xf32>
    %93 = arith.mulf %49, %54 : vector<1x256xf32>
    %94 = arith.mulf %57, %57 : vector<1x256xf32>
    %95 = arith.subf %93, %94 : vector<1x256xf32>
    %cst_22 = arith.constant 0.000000e+00 : f32
    %96 = vector.broadcast %cst_22 : f32 to vector<1x256xf32>
    %97 = arith.maximumf %95, %96 : vector<1x256xf32>
    %98 = arith.mulf %92, %97 : vector<1x256xf32>
    %99 = math.sqrt %98 : vector<1x256xf32>
    %cst_23 = arith.constant 4.000000e+00 : f32
    %100 = vector.broadcast %cst_23 : f32 to vector<1x256xf32>
    %101 = arith.mulf %100, %99 : vector<1x256xf32>
    %cst_24 = arith.constant 1.000000e-07 : f32
    %102 = vector.broadcast %cst_24 : f32 to vector<1x256xf32>
    %103 = arith.addf %101, %102 : vector<1x256xf32>
    %104 = arith.divf %66, %103 : vector<1x256xf32>
    %cst_25 = arith.constant 1.000000e-07 : f32
    %105 = vector.broadcast %cst_25 : f32 to vector<1x256xf32>
    %106 = arith.addf %104, %105 : vector<1x256xf32>
    %107 = math.log %106 : vector<1x256xf32>
    %cst_26 = arith.constant 5.000000e-01 : f32
    %108 = vector.broadcast %cst_26 : f32 to vector<1x256xf32>
    %109 = arith.mulf %107, %108 : vector<1x256xf32>
    %110 = arith.addf %79, %87 : vector<1x256xf32>
    %111 = arith.addf %110, %109 : vector<1x256xf32>
    %cst_27 = arith.constant 1.000000e-07 : f32
    %cst_28 = arith.constant 1.000000e+02 : f32
    %112 = vector.broadcast %cst_27 : f32 to vector<1x256xf32>
    %113 = arith.maximumf %112, %111 : vector<1x256xf32>
    %114 = vector.broadcast %cst_28 : f32 to vector<1x256xf32>
    %115 = arith.minimumf %114, %113 : vector<1x256xf32>
    %cst_29 = arith.constant 0.000000e+00 : f32
    %116 = vector.broadcast %cst_29 : f32 to vector<1x256xf32>
    %117 = arith.subf %116, %115 : vector<1x256xf32>
    %118 = math.exp %117 : vector<1x256xf32>
    %cst_30 = arith.constant 1.000000e+00 : f32
    %119 = vector.broadcast %cst_30 : f32 to vector<1x256xf32>
    %120 = arith.subf %119, %118 : vector<1x256xf32>
    %cst_31 = arith.constant 1.000000e-07 : f32
    %121 = vector.broadcast %cst_31 : f32 to vector<1x256xf32>
    %122 = arith.addf %120, %121 : vector<1x256xf32>
    %123 = math.sqrt %122 : vector<1x256xf32>
    %c0_32 = arith.constant 0 : index
    %c0_33 = arith.constant 0 : index
    %124 = vector.load %arg5[%c0_32, %c0_33] : memref<2x256xf32, #tpu.memory_space<vmem>>, vector<1x256xf32>
    %125 = arith.mulf %123, %15 : vector<1x256xf32>
    %126 = arith.addf %124, %125 : vector<1x256xf32>
    %c0_34 = arith.constant 0 : index
    %c0_35 = arith.constant 0 : index
    %127 = vector.load %arg5[%c0_34, %c0_35] : memref<2x256xf32, #tpu.memory_space<vmem>>, vector<1x256xf32>
    tpu.vector_store %arg5[%c0_34, %c0_35], %126 {strides = array<i32>} : memref<2x256xf32, #tpu.memory_space<vmem>>, vector<1x256xf32>,
    %cst_36 = arith.constant 5.000000e-01 : f32
    %128 = vector.broadcast %cst_36 : f32 to vector<1x256xf32>
    %129 = arith.mulf %10, %128 : vector<1x256xf32>
    %130 = arith.subf %8, %129 : vector<1x256xf32>
    %cst_37 = arith.constant 5.000000e-01 : f32
    %131 = vector.broadcast %cst_37 : f32 to vector<1x256xf32>
    %132 = arith.mulf %11, %131 : vector<1x256xf32>
    %133 = arith.subf %9, %132 : vector<1x256xf32>
    %cst_38 = arith.constant 5.000000e-01 : f32
    %134 = vector.broadcast %cst_38 : f32 to vector<1x256xf32>
    %135 = arith.mulf %10, %134 : vector<1x256xf32>
    %136 = arith.addf %8, %135 : vector<1x256xf32>
    %cst_39 = arith.constant 5.000000e-01 : f32
    %137 = vector.broadcast %cst_39 : f32 to vector<1x256xf32>
    %138 = arith.mulf %11, %137 : vector<1x256xf32>
    %139 = arith.addf %9, %138 : vector<1x256xf32>
    %140 = arith.subf %13, %130 : vector<1x256xf32>
    %141 = arith.subf %14, %133 : vector<1x256xf32>
    %142 = arith.subf %136, %13 : vector<1x256xf32>
    %143 = arith.subf %139, %14 : vector<1x256xf32>
    %cst_40 = arith.constant 0.000000e+00 : f32
    %144 = vector.broadcast %cst_40 : f32 to vector<1x256xf32>
    %cst_41 = arith.constant 0.000000e+00 : f32
    %cst_42 = arith.constant 1.499000e+01 : f32
    %145 = vector.broadcast %cst_41 : f32 to vector<1x256xf32>
    %146 = arith.maximumf %145, %140 : vector<1x256xf32>
    %147 = vector.broadcast %cst_42 : f32 to vector<1x256xf32>
    %148 = arith.minimumf %147, %146 : vector<1x256xf32>
    %149 = math.floor %148 : vector<1x256xf32>
    %cst_43 = arith.constant 1.000000e+00 : f32
    %150 = vector.broadcast %cst_43 : f32 to vector<1x256xf32>
    %151 = arith.addf %149, %150 : vector<1x256xf32>
    %152 = arith.subf %151, %148 : vector<1x256xf32>
    %cst_44 = arith.constant 1.000000e+00 : f32
    %153 = vector.broadcast %cst_44 : f32 to vector<1x256xf32>
    %154 = arith.subf %153, %152 : vector<1x256xf32>
    %155 = arith.fptosi %149 : vector<1x256xf32> to vector<1x256xi32>
    %c0_45 = arith.constant 0 : index
    %c0_46 = arith.constant 0 : index
    %156 = vector.load %arg1[%c0_45, %c0_46] : memref<64x256xf32, #tpu.memory_space<vmem>>, vector<16x256xf32>
    %cst_47 = arith.constant dense<0xFF800000> : vector<256xf32>
    %157 = vector.multi_reduction <maximumf>, %156, %cst_47 [0] : vector<16x256xf32> to vector<256xf32>
    %158 = vector.shape_cast %157 : vector<256xf32> to vector<1x256xf32>
    %159 = vector.broadcast %158 : vector<1x256xf32> to vector<16x256xf32>
    %160 = arith.subf %156, %159 : vector<16x256xf32>
    %161 = arith.truncf %160 : vector<16x256xf32> to vector<16x256xbf16>
    %162 = math.exp %161 : vector<16x256xbf16>
    %163 = arith.extf %162 : vector<16x256xbf16> to vector<16x256xf32>
    %cst_48 = arith.constant dense<0.000000e+00> : vector<256xf32>
    %164 = vector.multi_reduction <add>, %163, %cst_48 [0] : vector<16x256xf32> to vector<256xf32>
    %165 = vector.shape_cast %164 : vector<256xf32> to vector<1x256xf32>
    %166 = math.log %165 : vector<1x256xf32>
    %167 = arith.addf %166, %158 : vector<1x256xf32>
    %168 = tpu.iota {dimensions = array<i32: 0>} : vector<16x256xi32>
    %169 = vector.broadcast %155 : vector<1x256xi32> to vector<16x256xi32>
    %170 = arith.cmpi eq, %168, %169 : vector<16x256xi32>
    %cst_49 = arith.constant 0.000000e+00 : f32
    %171 = vector.shape_cast %152 : vector<1x256xf32> to vector<1x256xf32>
    %172 = vector.broadcast %171 : vector<1x256xf32> to vector<16x256xf32>
    %173 = vector.broadcast %cst_49 : f32 to vector<16x256xf32>
    %174 = arith.select %170, %172, %173 : vector<16x256xi1>, vector<16x256xf32>
    %c1_i32 = arith.constant 1 : i32
    %175 = vector.broadcast %c1_i32 : i32 to vector<1x256xi32>
    %176 = arith.addi %155, %175 : vector<1x256xi32>
    %177 = vector.broadcast %176 : vector<1x256xi32> to vector<16x256xi32>
    %178 = arith.cmpi eq, %168, %177 : vector<16x256xi32>
    %cst_50 = arith.constant 0.000000e+00 : f32
    %179 = vector.shape_cast %154 : vector<1x256xf32> to vector<1x256xf32>
    %180 = vector.broadcast %179 : vector<1x256xf32> to vector<16x256xf32>
    %181 = vector.broadcast %cst_50 : f32 to vector<16x256xf32>
    %182 = arith.select %178, %180, %181 : vector<16x256xi1>, vector<16x256xf32>
    %183 = arith.addf %174, %182 : vector<16x256xf32>
    %184 = arith.mulf %183, %156 : vector<16x256xf32>
    %cst_51 = arith.constant dense<0.000000e+00> : vector<256xf32>
    %185 = vector.multi_reduction <add>, %184, %cst_51 [0] : vector<16x256xf32> to vector<256xf32>
    %186 = vector.shape_cast %185 : vector<256xf32> to vector<1x256xf32>
    %187 = arith.subf %167, %186 : vector<1x256xf32>
    %188 = arith.addf %144, %187 : vector<1x256xf32>
    %cst_52 = arith.constant 0.000000e+00 : f32
    %cst_53 = arith.constant 1.499000e+01 : f32
    %189 = vector.broadcast %cst_52 : f32 to vector<1x256xf32>
    %190 = arith.maximumf %189, %141 : vector<1x256xf32>
    %191 = vector.broadcast %cst_53 : f32 to vector<1x256xf32>
    %192 = arith.minimumf %191, %190 : vector<1x256xf32>
    %193 = math.floor %192 : vector<1x256xf32>
    %cst_54 = arith.constant 1.000000e+00 : f32
    %194 = vector.broadcast %cst_54 : f32 to vector<1x256xf32>
    %195 = arith.addf %193, %194 : vector<1x256xf32>
    %196 = arith.subf %195, %192 : vector<1x256xf32>
    %cst_55 = arith.constant 1.000000e+00 : f32
    %197 = vector.broadcast %cst_55 : f32 to vector<1x256xf32>
    %198 = arith.subf %197, %196 : vector<1x256xf32>
    %199 = arith.fptosi %193 : vector<1x256xf32> to vector<1x256xi32>
    %c16 = arith.constant 16 : index
    %c0_56 = arith.constant 0 : index
    %200 = vector.load %arg1[%c16, %c0_56] : memref<64x256xf32, #tpu.memory_space<vmem>>, vector<16x256xf32>
    %cst_57 = arith.constant dense<0xFF800000> : vector<256xf32>
    %201 = vector.multi_reduction <maximumf>, %200, %cst_57 [0] : vector<16x256xf32> to vector<256xf32>
    %202 = vector.shape_cast %201 : vector<256xf32> to vector<1x256xf32>
    %203 = vector.broadcast %202 : vector<1x256xf32> to vector<16x256xf32>
    %204 = arith.subf %200, %203 : vector<16x256xf32>
    %205 = arith.truncf %204 : vector<16x256xf32> to vector<16x256xbf16>
    %206 = math.exp %205 : vector<16x256xbf16>
    %207 = arith.extf %206 : vector<16x256xbf16> to vector<16x256xf32>
    %cst_58 = arith.constant dense<0.000000e+00> : vector<256xf32>
    %208 = vector.multi_reduction <add>, %207, %cst_58 [0] : vector<16x256xf32> to vector<256xf32>
    %209 = vector.shape_cast %208 : vector<256xf32> to vector<1x256xf32>
    %210 = math.log %209 : vector<1x256xf32>
    %211 = arith.addf %210, %202 : vector<1x256xf32>
    %212 = tpu.iota {dimensions = array<i32: 0>} : vector<16x256xi32>
    %213 = vector.broadcast %199 : vector<1x256xi32> to vector<16x256xi32>
    %214 = arith.cmpi eq, %212, %213 : vector<16x256xi32>
    %cst_59 = arith.constant 0.000000e+00 : f32
    %215 = vector.shape_cast %196 : vector<1x256xf32> to vector<1x256xf32>
    %216 = vector.broadcast %215 : vector<1x256xf32> to vector<16x256xf32>
    %217 = vector.broadcast %cst_59 : f32 to vector<16x256xf32>
    %218 = arith.select %214, %216, %217 : vector<16x256xi1>, vector<16x256xf32>
    %c1_i32_60 = arith.constant 1 : i32
    %219 = vector.broadcast %c1_i32_60 : i32 to vector<1x256xi32>
    %220 = arith.addi %199, %219 : vector<1x256xi32>
    %221 = vector.broadcast %220 : vector<1x256xi32> to vector<16x256xi32>
    %222 = arith.cmpi eq, %212, %221 : vector<16x256xi32>
    %cst_61 = arith.constant 0.000000e+00 : f32
    %223 = vector.shape_cast %198 : vector<1x256xf32> to vector<1x256xf32>
    %224 = vector.broadcast %223 : vector<1x256xf32> to vector<16x256xf32>
    %225 = vector.broadcast %cst_61 : f32 to vector<16x256xf32>
    %226 = arith.select %222, %224, %225 : vector<16x256xi1>, vector<16x256xf32>
    %227 = arith.addf %218, %226 : vector<16x256xf32>
    %228 = arith.mulf %227, %200 : vector<16x256xf32>
    %cst_62 = arith.constant dense<0.000000e+00> : vector<256xf32>
    %229 = vector.multi_reduction <add>, %228, %cst_62 [0] : vector<16x256xf32> to vector<256xf32>
    %230 = vector.shape_cast %229 : vector<256xf32> to vector<1x256xf32>
    %231 = arith.subf %211, %230 : vector<1x256xf32>
    %232 = arith.addf %188, %231 : vector<1x256xf32>
    %cst_63 = arith.constant 0.000000e+00 : f32
    %cst_64 = arith.constant 1.499000e+01 : f32
    %233 = vector.broadcast %cst_63 : f32 to vector<1x256xf32>
    %234 = arith.maximumf %233, %142 : vector<1x256xf32>
    %235 = vector.broadcast %cst_64 : f32 to vector<1x256xf32>
    %236 = arith.minimumf %235, %234 : vector<1x256xf32>
    %237 = math.floor %236 : vector<1x256xf32>
    %cst_65 = arith.constant 1.000000e+00 : f32
    %238 = vector.broadcast %cst_65 : f32 to vector<1x256xf32>
    %239 = arith.addf %237, %238 : vector<1x256xf32>
    %240 = arith.subf %239, %236 : vector<1x256xf32>
    %cst_66 = arith.constant 1.000000e+00 : f32
    %241 = vector.broadcast %cst_66 : f32 to vector<1x256xf32>
    %242 = arith.subf %241, %240 : vector<1x256xf32>
    %243 = arith.fptosi %237 : vector<1x256xf32> to vector<1x256xi32>
    %c32 = arith.constant 32 : index
    %c0_67 = arith.constant 0 : index
    %244 = vector.load %arg1[%c32, %c0_67] : memref<64x256xf32, #tpu.memory_space<vmem>>, vector<16x256xf32>
    %cst_68 = arith.constant dense<0xFF800000> : vector<256xf32>
    %245 = vector.multi_reduction <maximumf>, %244, %cst_68 [0] : vector<16x256xf32> to vector<256xf32>
    %246 = vector.shape_cast %245 : vector<256xf32> to vector<1x256xf32>
    %247 = vector.broadcast %246 : vector<1x256xf32> to vector<16x256xf32>
    %248 = arith.subf %244, %247 : vector<16x256xf32>
    %249 = arith.truncf %248 : vector<16x256xf32> to vector<16x256xbf16>
    %250 = math.exp %249 : vector<16x256xbf16>
    %251 = arith.extf %250 : vector<16x256xbf16> to vector<16x256xf32>
    %cst_69 = arith.constant dense<0.000000e+00> : vector<256xf32>
    %252 = vector.multi_reduction <add>, %251, %cst_69 [0] : vector<16x256xf32> to vector<256xf32>
    %253 = vector.shape_cast %252 : vector<256xf32> to vector<1x256xf32>
    %254 = math.log %253 : vector<1x256xf32>
    %255 = arith.addf %254, %246 : vector<1x256xf32>
    %256 = tpu.iota {dimensions = array<i32: 0>} : vector<16x256xi32>
    %257 = vector.broadcast %243 : vector<1x256xi32> to vector<16x256xi32>
    %258 = arith.cmpi eq, %256, %257 : vector<16x256xi32>
    %cst_70 = arith.constant 0.000000e+00 : f32
    %259 = vector.shape_cast %240 : vector<1x256xf32> to vector<1x256xf32>
    %260 = vector.broadcast %259 : vector<1x256xf32> to vector<16x256xf32>
    %261 = vector.broadcast %cst_70 : f32 to vector<16x256xf32>
    %262 = arith.select %258, %260, %261 : vector<16x256xi1>, vector<16x256xf32>
    %c1_i32_71 = arith.constant 1 : i32
    %263 = vector.broadcast %c1_i32_71 : i32 to vector<1x256xi32>
    %264 = arith.addi %243, %263 : vector<1x256xi32>
    %265 = vector.broadcast %264 : vector<1x256xi32> to vector<16x256xi32>
    %266 = arith.cmpi eq, %256, %265 : vector<16x256xi32>
    %cst_72 = arith.constant 0.000000e+00 : f32
    %267 = vector.shape_cast %242 : vector<1x256xf32> to vector<1x256xf32>
    %268 = vector.broadcast %267 : vector<1x256xf32> to vector<16x256xf32>
    %269 = vector.broadcast %cst_72 : f32 to vector<16x256xf32>
    %270 = arith.select %266, %268, %269 : vector<16x256xi1>, vector<16x256xf32>
    %271 = arith.addf %262, %270 : vector<16x256xf32>
    %272 = arith.mulf %271, %244 : vector<16x256xf32>
    %cst_73 = arith.constant dense<0.000000e+00> : vector<256xf32>
    %273 = vector.multi_reduction <add>, %272, %cst_73 [0] : vector<16x256xf32> to vector<256xf32>
    %274 = vector.shape_cast %273 : vector<256xf32> to vector<1x256xf32>
    %275 = arith.subf %255, %274 : vector<1x256xf32>
    %276 = arith.addf %232, %275 : vector<1x256xf32>
    %cst_74 = arith.constant 0.000000e+00 : f32
    %cst_75 = arith.constant 1.499000e+01 : f32
    %277 = vector.broadcast %cst_74 : f32 to vector<1x256xf32>
    %278 = arith.maximumf %277, %143 : vector<1x256xf32>
    %279 = vector.broadcast %cst_75 : f32 to vector<1x256xf32>
    %280 = arith.minimumf %279, %278 : vector<1x256xf32>
    %281 = math.floor %280 : vector<1x256xf32>
    %cst_76 = arith.constant 1.000000e+00 : f32
    %282 = vector.broadcast %cst_76 : f32 to vector<1x256xf32>
    %283 = arith.addf %281, %282 : vector<1x256xf32>
    %284 = arith.subf %283, %280 : vector<1x256xf32>
    %cst_77 = arith.constant 1.000000e+00 : f32
    %285 = vector.broadcast %cst_77 : f32 to vector<1x256xf32>
    %286 = arith.subf %285, %284 : vector<1x256xf32>
    %287 = arith.fptosi %281 : vector<1x256xf32> to vector<1x256xi32>
    %c48 = arith.constant 48 : index
    %c0_78 = arith.constant 0 : index
    %288 = vector.load %arg1[%c48, %c0_78] : memref<64x256xf32, #tpu.memory_space<vmem>>, vector<16x256xf32>
    %cst_79 = arith.constant dense<0xFF800000> : vector<256xf32>
    %289 = vector.multi_reduction <maximumf>, %288, %cst_79 [0] : vector<16x256xf32> to vector<256xf32>
    %290 = vector.shape_cast %289 : vector<256xf32> to vector<1x256xf32>
    %291 = vector.broadcast %290 : vector<1x256xf32> to vector<16x256xf32>
    %292 = arith.subf %288, %291 : vector<16x256xf32>
    %293 = arith.truncf %292 : vector<16x256xf32> to vector<16x256xbf16>
    %294 = math.exp %293 : vector<16x256xbf16>
    %295 = arith.extf %294 : vector<16x256xbf16> to vector<16x256xf32>
    %cst_80 = arith.constant dense<0.000000e+00> : vector<256xf32>
    %296 = vector.multi_reduction <add>, %295, %cst_80 [0] : vector<16x256xf32> to vector<256xf32>
    %297 = vector.shape_cast %296 : vector<256xf32> to vector<1x256xf32>
    %298 = math.log %297 : vector<1x256xf32>
    %299 = arith.addf %298, %290 : vector<1x256xf32>
    %300 = tpu.iota {dimensions = array<i32: 0>} : vector<16x256xi32>
    %301 = vector.broadcast %287 : vector<1x256xi32> to vector<16x256xi32>
    %302 = arith.cmpi eq, %300, %301 : vector<16x256xi32>
    %cst_81 = arith.constant 0.000000e+00 : f32
    %303 = vector.shape_cast %284 : vector<1x256xf32> to vector<1x256xf32>
    %304 = vector.broadcast %303 : vector<1x256xf32> to vector<16x256xf32>
    %305 = vector.broadcast %cst_81 : f32 to vector<16x256xf32>
    %306 = arith.select %302, %304, %305 : vector<16x256xi1>, vector<16x256xf32>
    %c1_i32_82 = arith.constant 1 : i32
    %307 = vector.broadcast %c1_i32_82 : i32 to vector<1x256xi32>
    %308 = arith.addi %287, %307 : vector<1x256xi32>
    %309 = vector.broadcast %308 : vector<1x256xi32> to vector<16x256xi32>
    %310 = arith.cmpi eq, %300, %309 : vector<16x256xi32>
    %cst_83 = arith.constant 0.000000e+00 : f32
    %311 = vector.shape_cast %286 : vector<1x256xf32> to vector<1x256xf32>
    %312 = vector.broadcast %311 : vector<1x256xf32> to vector<16x256xf32>
    %313 = vector.broadcast %cst_83 : f32 to vector<16x256xf32>
    %314 = arith.select %310, %312, %313 : vector<16x256xi1>, vector<16x256xf32>
    %315 = arith.addf %306, %314 : vector<16x256xf32>
    %316 = arith.mulf %315, %288 : vector<16x256xf32>
    %cst_84 = arith.constant dense<0.000000e+00> : vector<256xf32>
    %317 = vector.multi_reduction <add>, %316, %cst_84 [0] : vector<16x256xf32> to vector<256xf32>
    %318 = vector.shape_cast %317 : vector<256xf32> to vector<1x256xf32>
    %319 = arith.subf %299, %318 : vector<1x256xf32>
    %320 = arith.addf %276, %319 : vector<1x256xf32>
    %c1_85 = arith.constant 1 : index
    %c0_86 = arith.constant 0 : index
    %321 = vector.load %arg5[%c1_85, %c0_86] : memref<2x256xf32, #tpu.memory_space<vmem>>, vector<1x256xf32>
    %cst_87 = arith.constant 2.500000e-01 : f32
    %322 = vector.broadcast %cst_87 : f32 to vector<1x256xf32>
    %323 = arith.mulf %322, %15 : vector<1x256xf32>
    %324 = arith.mulf %320, %323 : vector<1x256xf32>
    %325 = arith.addf %321, %324 : vector<1x256xf32>
    %c1_88 = arith.constant 1 : index
    %c0_89 = arith.constant 0 : index
    %326 = vector.load %arg5[%c1_88, %c0_89] : memref<2x256xf32, #tpu.memory_space<vmem>>, vector<1x256xf32>
    tpu.vector_store %arg5[%c1_88, %c0_89], %325 {strides = array<i32>} : memref<2x256xf32, #tpu.memory_space<vmem>>, vector<1x256xf32>,
    %c0_i32_90 = arith.constant 0 : i32
    %327 = arith.cmpi eq, %arg0, %c0_i32_90 : i32
    %328 = arith.extui %327 : i1 to i32
    %c0_i32_91 = arith.constant 0 : i32
    %329 = arith.cmpi ne, %328, %c0_i32_91 : i32
    scf.if %329 {
      %c0_92 = arith.constant 0 : index
      %c0_93 = arith.constant 0 : index
      %330 = vector.load %arg5[%c0_92, %c0_93] : memref<2x256xf32, #tpu.memory_space<vmem>>, vector<1x256xf32>
      %331 = vector.shape_cast %330 : vector<1x256xf32> to vector<1x1x256xf32>
      %cst_94 = arith.constant dense<0.000000e+00> : vector<1xf32>
      %332 = vector.multi_reduction <add>, %331, %cst_94 [1, 2] : vector<1x1x256xf32> to vector<1xf32>
      %333 = vector.shape_cast %332 : vector<1xf32> to vector<1x1x1xf32>
      %334 = vector.extract %333[0, 0, 0] : f32 from vector<1x1x1xf32>
      %c0_95 = arith.constant 0 : index
      %c0_96 = arith.constant 0 : index
      %335 = memref.load %arg3[%c0_95, %c0_96] : memref<1x1xf32, #tpu.memory_space<smem>>
      memref.store %334, %arg3[%c0_95, %c0_96] : memref<1x1xf32, #tpu.memory_space<smem>>
      %c1_97 = arith.constant 1 : index
      %c0_98 = arith.constant 0 : index
      %336 = vector.load %arg5[%c1_97, %c0_98] : memref<2x256xf32, #tpu.memory_space<vmem>>, vector<1x256xf32>
      %337 = vector.shape_cast %336 : vector<1x256xf32> to vector<1x1x256xf32>
      %cst_99 = arith.constant dense<0.000000e+00> : vector<1xf32>
      %338 = vector.multi_reduction <add>, %337, %cst_99 [1, 2] : vector<1x1x256xf32> to vector<1xf32>
      %339 = vector.shape_cast %338 : vector<1xf32> to vector<1x1x1xf32>
      %340 = vector.extract %339[0, 0, 0] : f32 from vector<1x1x1xf32>
      %c0_100 = arith.constant 0 : index
      %c0_101 = arith.constant 0 : index
      %341 = memref.load %arg4[%c0_100, %c0_101] : memref<1x1xf32, #tpu.memory_space<smem>>
      memref.store %340, %arg4[%c0_100, %c0_101] : memref<1x1xf32, #tpu.memory_space<smem>>
    } else {
    }
    return
  }
  func.func @transform_0(%arg0: i32) -> (i32, i32) {
    %c0_i32 = arith.constant 0 : i32
    %c0_i32_0 = arith.constant 0 : i32
    return %c0_i32, %arg0 : i32, i32
  }
  func.func @transform_1(%arg0: i32) -> (i32, i32) {
    %c0_i32 = arith.constant 0 : i32
    %c0_i32_0 = arith.constant 0 : i32
    return %c0_i32, %arg0 : i32, i32
  }
  func.func @transform_2(%arg0: i32) -> (i32, i32) {
    %c0_i32 = arith.constant 0 : i32
    %c0_i32_0 = arith.constant 0 : i32
    %c0_i32_1 = arith.constant 0 : i32
    return %c0_i32, %c0_i32_0 : i32, i32
  }
  func.func @transform_3(%arg0: i32) -> (i32, i32) {
    %c0_i32 = arith.constant 0 : i32
    %c0_i32_0 = arith.constant 0 : i32
    %c0_i32_1 = arith.constant 0 : i32
    return %c0_i32, %c0_i32_0 : i32, i32
  }
}

</mosaic_0001>

<bundles_post_ra>
// kernel: tpu_custom_call.1
= control target key start
LH: loop header
LB: loop body
LE: loop exit
PB: predicated region body
PF: predicated region fallthrough
CT: control target
= control target key end

     0   :  { %9 = vsyncpa [#allocation4], 0  ;;  %s2287_s0 = inlined_call_operand.hbm [shape: f32[64,256], index: 0, kind: input, shape index: {}]   ;;  %s2288_s1 = inlined_call_operand.hbm [shape: f32[16,256], index: 1, kind: input, shape index: {}]   ;;  %s2289_s2 = inlined_call_operand.hbm [shape: f32[1,1], index: 2, kind: output, shape index: {0}]   ;;  %s2290_s3 = inlined_call_operand.hbm [shape: f32[1,1], index: 3, kind: output, shape index: {1}]  }
   0x1   :  { %10 = vsyncpa [#allocation7], 0 }
   0x2   :  { %11 = vsyncpa [#allocation5], 0 }
   0x3   :  { %12 = vsyncpa [#allocation10], 0  ;;  %s17_s14 = sshll.u32 %s2287_s0, 4  ;;  %s1609_s15 = smov [#allocation3]   ;;  %s18_s14 = int_to_ptr.hbm [resolvable:$true] %s17_s14 }
   0x4   :  { %s19_s16 = sshll.u32 %s1609_s15, 4  ;;  %s30_s19 = sshll.u32 %s2288_s1, 4  ;;  %s20_s16 = int_to_ptr.vmem [resolvable:$true] %s19_s16  ;;  %s31_s19 = int_to_ptr.hbm [resolvable:$true] %s30_s19 }
   0x5   :  { %s1610_s20 = smov 256   ;;  %s1611_s21 = smov 16  }
   0x6   :  { %25 = dma.hbm_to_vmem [thread:$0]  %s18_s14, 2048, %s20_s16, [#allocation4], %s1610_s20, %s1610_s20, %s1611_s21  }
   0x7   :  { %s1612_s22 = smov [#allocation6]  }
   0x8   :  { %s32_s23 = sshll.u32 %s1612_s22, 4  ;;  %s33_s23 = int_to_ptr.vmem [resolvable:$true] %s32_s23 }
   0x9   :  { %38 = dma.hbm_to_vmem [thread:$0]  %s31_s19, 512, %s33_s23, [#allocation7], %s1610_s20, %s1610_s20, %s1611_s21  }
   0xa   :  { %1601 = dma.done.wait [#allocation4], 2048  }
   0xb   :  { %1602 = vsyncadd [#allocation4], 4294965248 }
   0xc   :  { %1603 = dma.done.wait [#allocation7], 512  }
   0xd   :  { %1604 = vsyncadd [#allocation7], 4294966784  ;;  %v1613_v0 = vmov 0.0   ;;  %v1649_v1 = vld [vmem:[#allocation6 + $0x4] ss:$8 sm:$0x3] }
   0xe   :  { %51 = vst [vmem:[#allocation2] sm:$0xf] %v1613_v0  ;;  %v1651_v2 = vld [vmem:[#allocation6 + $0x11] ss:$8 sm:$0x3]  ;;  %v84_v4 = vand.u32 2139095040, %v1649_v1 }
   0xf   :  { %v81_v3 = vand.u32 2147483647, %v1649_v1  ;;  %v407_v5 = vand.u32 2147483647, %v1651_v2  ;;  %v410_v6 = vand.u32 2139095040, %v1651_v2  ;;  %s1405_s24 = sshll.u32 %s2289_s2, 4  ;;  %s1406_s24 = int_to_ptr.hbm [resolvable:$true] %s1405_s24 }
  0x10   :  { %v85_v7 = vshrl.u32 %v84_v4, 23  ;;  %v1614_v24 = vmov 683565275   ;;  %v1615_v26 = vmov 2475754826   ;;  %s1621_s26 = smov [#allocation8]  }
  0x11   :  { %v88_v8 = vand.u32 8388607, %v81_v3  ;;  %v411_v9 = vshrl.u32 %v410_v6, 23  ;;  %v414_v13 = vand.u32 8388607, %v407_v5  ;;  %s1414_s29 = sshll.u32 %s2290_s3, 4  ;;  %s1415_s29 = int_to_ptr.hbm [resolvable:$true] %s1414_s29 }
  0x12   :  { %v1431_v10 = vadd.s32 4294967169, %v85_v7  ;;  %v1616_v28 = vmov 2131351028   ;;  %v1617_v30 = vmov 2102212464   ;;  %s1622_s4 = smov [#allocation9]  }
  0x13   :  { %v89_v11 = vor.u32 8388608, %v88_v8  ;;  %v1437_v12 = vadd.s32 4294967169, %v411_v9  ;;  %v415_v18 = vor.u32 8388608, %v414_v13  ;;  %v1618_v32 = vmov 920167782  }
  0x14   :  { %v91_v14 = vadd.s32 1, %v1431_v10  ;;  %v1619_v41 = vmov 1326507024  }
  0x15   :  { %v417_v15 = vadd.s32 1, %v1437_v12  ;;  %v1661_v17 = vshll.u32 %v89_v11, 8  ;;  %v1671_v35 = vshll.u32 %v415_v18, 8 }
  0x16   :  { %vm92_vm0 = vcmp.gt.s32.totalorder %v91_v14, 0 }
  0x17   :  { %v93_v16 = vsel %vm92_vm0, %v91_v14, 0  ;;  %vm418_vm1 = vcmp.gt.s32.totalorder %v417_v15, 0  ;;  %v130_v34 = vand.u32 65535, %v1661_v17  ;;  %v131_v39 = vshrl.u32 %v1661_v17, 16 }
  0x18   :  { %v95_v19 = vand.u32 31, %v93_v16  ;;  %v419_v20 = vsel %vm418_vm1, %v417_v15, 0  ;;  %v1663_v21 = vshrl.u32 %v93_v16, 5 }
  0x19   :  { %v1665_v22 = vand.u32 31, %v419_v20  ;;  %v1689_v52 = vshrl.u32 %v419_v20, 5 }
  0x1a   :  { %v96_v23 = vsub.s32 32, %v95_v19  ;;  %v98_v25 = vshll.u32 %v1614_v24, %v95_v19  ;;  %v101_v27 = vshll.u32 %v1615_v26, %v95_v19  ;;  %v104_v29 = vshll.u32 %v1616_v28, %v95_v19 }
  0x1b   :  { %v107_v31 = vshll.u32 %v1617_v30, %v95_v19  ;;  %v110_v33 = vshll.u32 %v1618_v32, %v95_v19  ;;  %vm113_vm2 = vcmp.lt.s32.totalorder %v1663_v21, 1  ;;  %vm116_vm3 = vcmp.lt.s32.totalorder %v1663_v21, 4 }
  0x1c   :  { %v99_v36 = vshrl.u32 %v1615_v26, %v96_v23  ;;  %v102_v37 = vshrl.u32 %v1616_v28, %v96_v23  ;;  %v105_v38 = vshrl.u32 %v1617_v30, %v96_v23  ;;  %v108_v40 = vshrl.u32 %v1618_v32, %v96_v23 }
  0x1d   :  { %v111_v42 = vshrl.u32 %v1619_v41, %v96_v23  ;;  %v1680_v46 = vsub.s32 32, %v1665_v22  ;;  %v97_v47 = vshrl.u32 %v1614_v24, %v96_v23  ;;  %vm115_vm4 = vcmp.lt.s32.totalorder %v1663_v21, 3 }
  0x1e   :  { %v100_v43 = vor.u32 %v99_v36, %v98_v25  ;;  %v103_v44 = vor.u32 %v102_v37, %v101_v27  ;;  %v106_v45 = vor.u32 %v105_v38, %v104_v29  ;;  %v109_v48 = vor.u32 %v108_v40, %v107_v31 }
  0x1f   :  { %v112_v49 = vor.u32 %v111_v42, %v110_v33  ;;  %vm114_vm5 = vcmp.lt.s32.totalorder %v1663_v21, 2  ;;  %v424_v55 = vshll.u32 %v1614_v24, %v1665_v22  ;;  %v427_v56 = vshll.u32 %v1615_v26, %v1665_v22 }
  0x20   :  { %v121_v50 = vsel %vm113_vm2, %v100_v43, %v103_v44  ;;  %v125_v51 = vsel %vm113_vm2, %v103_v44, %v106_v45  ;;  %v122_v53 = vsel %vm116_vm3, %v109_v48, 920167782  ;;  %v118_v57 = vsel %vm116_vm3, %v106_v45, 2102212464 }
  0x21   :  { %v126_v54 = vsel %vm116_vm3, %v112_v49, 1326507024  ;;  %v123_v58 = vsel %vm115_vm4, %v106_v45, %v122_v53  ;;  %v425_v60 = vshrl.u32 %v1615_v26, %v1680_v46  ;;  %v117_v61 = vsel %vm113_vm2, %v97_v47, %v100_v43 }
  0x22   :  { %v127_v59 = vsel %vm115_vm4, %v109_v48, %v126_v54  ;;  %v124_v62 = vsel %vm114_vm5, %v121_v50, %v123_v58  ;;  %v428_v0 = vshrl.u32 %v1616_v28, %v1680_v46  ;;  %v119_v9 = vsel %vm115_vm4, %v103_v44, %v118_v57 }
  0x23   :  { %v128_v63 = vsel %vm114_vm5, %v125_v51, %v127_v59  ;;  %v154_v7 = vand.u32 65535, %v124_v62  ;;  %v155_v8 = vshrl.u32 %v124_v62, 16  ;;  %v1714_v10 = vor.u32 %v425_v60, %v424_v55 }
  0x24   :  { %v132_v4 = vand.u32 65535, %v128_v63  ;;  %v133_v6 = vshrl.u32 %v128_v63, 16  ;;  %v1716_v11 = vor.u32 %v428_v0, %v427_v56  ;;  %v430_v12 = vshll.u32 %v1616_v28, %v1665_v22 }
  0x25   :  { %v431_v16 = vshrl.u32 %v1617_v30, %v1680_v46  ;;  %v156_v19 = vmul.u32 %v154_v7, %v130_v34  ;;  %v157_v20 = vmul.u32 %v155_v8, %v130_v34  ;;  %v158_v23 = vmul.u32 %v154_v7, %v131_v39 }
  0x26   :  { %v134_v13 = vmul.u32 %v132_v4, %v130_v34  ;;  %v135_v14 = vmul.u32 %v133_v6, %v130_v34  ;;  %v136_v15 = vmul.u32 %v132_v4, %v131_v39  ;;  %v137_v18 = vmul.u32 %v133_v6, %v131_v39 }
  0x27   :  { %v159_v29 = vmul.u32 %v155_v8, %v131_v39  ;;  %v160_v33 = vshll.u32 %v157_v20, 16  ;;  %v161_v36 = vshrl.u32 %v157_v20, 16  ;;  %v162_v37 = vshll.u32 %v158_v23, 16 }
  0x28   :  { %v138_v25 = vshll.u32 %v135_v14, 16  ;;  %v139_v26 = vshrl.u32 %v135_v14, 16  ;;  %v140_v27 = vshll.u32 %v136_v15, 16  ;;  %v141_v31 = vshrl.u32 %v136_v15, 16 }
  0x29   :  { %v163_v38 = vshrl.u32 %v158_v23, 16  ;;  %v433_v40 = vshll.u32 %v1617_v30, %v1665_v22  ;;  %v1620_v42 = vmov 0   ;;  %vm164_vm7 = vc.u32 %v156_v19, %v160_v33 }
  0x2a   :  { %vm142_vm6 = vc.u32 %v134_v13, %v138_v25  ;;  %v144_v28 = vadd.s32 %v138_v25, %v134_v13  ;;  %v166_v34 = vadd.s32 %v160_v33, %v156_v19  ;;  %v434_v44 = vshrl.u32 %v1618_v32, %v1680_v46 }
  0x2b   :  { %v143_v43 = vsel %vm142_vm6, 1, %v1620_v42  ;;  %v165_v39 = vsel %vm164_vm7, 1, %v1620_v42  ;;  %v436_v47 = vshll.u32 %v1618_v32, %v1665_v22  ;;  %v432_v30 = vor.u32 %v431_v16, %v430_v12 }
  0x2c   :  { %v145_v45 = vadd.s32 %v143_v43, %v137_v18  ;;  %vm146_vm8 = vc.u32 %v144_v28, %v140_v27  ;;  %v167_v49 = vadd.s32 %v165_v39, %v159_v29  ;;  %vm168_vm9 = vc.u32 %v166_v34, %v162_v37 }
  0x2d   :  { %v147_v48 = vsel %vm146_vm8, 1, %v1620_v42  ;;  %v169_v51 = vsel %vm168_vm9, 1, %v1620_v42  ;;  %v435_v53 = vor.u32 %v434_v44, %v433_v40  ;;  %v437_v54 = vshrl.u32 %v1619_v41, %v1680_v46 }
  0x2e   :  { %v149_v50 = vadd.s32 %v147_v48, %v145_v45  ;;  %v1733_v55 = vadd.s32 %v166_v34, %v162_v37  ;;  %v171_v56 = vadd.s32 %v169_v51, %v167_v49  ;;  %vm439_vm10 = vcmp.lt.s32.totalorder %v1689_v52, 1 }
  0x2f   :  { %vm441_vm11 = vcmp.lt.s32.totalorder %v1689_v52, 3  ;;  %v438_v32 = vor.u32 %v437_v54, %v436_v47  ;;  %vm440_vm12 = vcmp.lt.s32.totalorder %v1689_v52, 2  ;;  %vm442_vm13 = vcmp.lt.s32.totalorder %v1689_v52, 4 }
  0x30   :  { %v150_v22 = vadd.s32 %v149_v50, %v139_v26  ;;  %v120_v57 = vsel %vm114_vm5, %v117_v61, %v119_v9  ;;  %v172_v58 = vadd.s32 %v171_v56, %v161_v36  ;;  %v447_v41 = vsel %vm439_vm10, %v1714_v10, %v1716_v11 }
  0x31   :  { %v448_v59 = vsel %vm442_vm13, %v435_v53, 920167782  ;;  %v451_v63 = vsel %vm439_vm10, %v1716_v11, %v432_v30  ;;  %v456_v21 = vand.u32 65535, %v1671_v35  ;;  %v452_v4 = vsel %vm442_vm13, %v438_v32, 1326507024 }
  0x32   :  { %v1747_v60 = vadd.s32 %v150_v22, %v141_v31  ;;  %v449_v62 = vsel %vm441_vm11, %v432_v30, %v448_v59  ;;  %v173_v61 = vadd.s32 %v172_v58, %v163_v38  ;;  %v457_v6 = vshrl.u32 %v1671_v35, 16 }
  0x33   :  { %v450_v0 = vsel %vm440_vm12, %v447_v41, %v449_v62  ;;  %v174_v7 = vmul.u32 %v1661_v17, %v120_v57  ;;  %v453_v8 = vsel %vm441_vm11, %v435_v53, %v452_v4  ;;  %v423_v19 = vshrl.u32 %v1614_v24, %v1680_v46 }
  0x34   :  { %vm176_vm14 = vc.u32 %v1747_v60, %v1733_v55  ;;  %v480_v9 = vand.u32 65535, %v450_v0  ;;  %v177_v12 = vadd.s32 1, %v173_v61  ;;  %v454_v13 = vsel %vm440_vm12, %v451_v63, %v453_v8 }
  0x35   :  { %v481_v14 = vshrl.u32 %v450_v0, 16  ;;  %v458_v15 = vand.u32 65535, %v454_v13  ;;  %v459_v16 = vshrl.u32 %v454_v13, 16  ;;  %v444_v36 = vsel %vm442_vm13, %v432_v30, 2102212464 }
  0x36   :  { %v178_v18 = vsel %vm176_vm14, %v177_v12, %v173_v61  ;;  %v484_v17 = vmul.u32 %v480_v9, %v457_v6  ;;  %v482_v27 = vmul.u32 %v480_v9, %v456_v21  ;;  %v443_v38 = vsel %vm439_vm10, %v423_v19, %v1714_v10 }
  0x37   :  { %v483_v20 = vmul.u32 %v481_v14, %v456_v21  ;;  %v179_v23 = vadd.s32 %v178_v18, %v174_v7  ;;  %v460_v25 = vmul.u32 %v458_v15, %v456_v21  ;;  %v461_v26 = vmul.u32 %v459_v16, %v456_v21 }
  0x38   :  { %v462_v29 = vmul.u32 %v458_v15, %v457_v6  ;;  %v463_v37 = vmul.u32 %v459_v16, %v457_v6  ;;  %v485_v24 = vmul.u32 %v481_v14, %v457_v6  ;;  %v488_v46 = vshll.u32 %v484_v17, 16 }
  0x39   :  { %v486_v31 = vshll.u32 %v483_v20, 16  ;;  %v180_v33 = vadd.s32 536870912, %v179_v23  ;;  %v464_v28 = vshll.u32 %v461_v26, 16  ;;  %v445_v44 = vsel %vm441_vm11, %v1716_v11, %v444_v36 }
  0x3a   :  { %v466_v40 = vshll.u32 %v462_v29, 16  ;;  %v465_v10 = vshrl.u32 %v461_v26, 16  ;;  %v487_v50 = vshrl.u32 %v483_v20, 16  ;;  %v467_v54 = vshrl.u32 %v462_v29, 16 }
  0x3b   :  { %v1774_v43 = vshrl.u32 %v180_v33, 30  ;;  %vm468_vm15 = vc.u32 %v460_v25, %v464_v28  ;;  %v470_v34 = vadd.s32 %v464_v28, %v460_v25  ;;  %vm490_vm0 = vc.u32 %v482_v27, %v486_v31 }
  0x3c   :  { %v469_v45 = vsel %vm468_vm15, 1, %v1620_v42  ;;  %v491_v39 = vsel %vm490_vm0, 1, %v1620_v42  ;;  %v492_v47 = vadd.s32 %v486_v31, %v482_v27  ;;  %v489_v22 = vshrl.u32 %v484_v17, 16 }
  0x3d   :  { %v182_v48 = vshll.u32 %v1774_v43, 30  ;;  %v471_v49 = vadd.s32 %v469_v45, %v463_v37  ;;  %vm472_vm1 = vc.u32 %v470_v34, %v466_v40  ;;  %v493_v51 = vadd.s32 %v491_v39, %v485_v24 }
  0x3e   :  { %v473_v30 = vsel %vm472_vm1, 1, %v1620_v42  ;;  %vm494_vm2 = vc.u32 %v492_v47, %v488_v46  ;;  %v496_v41 = vadd.s32 %v492_v47, %v488_v46  ;;  %v446_v59 = vsel %vm440_vm12, %v443_v38, %v445_v44 }
  0x3f   :  { %v183_v53 = vsub.s32 %v179_v23, %v182_v48  ;;  %v475_v56 = vadd.s32 %v473_v30, %v471_v49  ;;  %v495_v11 = vsel %vm494_vm2, 1, %v1620_v42  ;;  %v500_v4 = vmul.u32 %v1671_v35, %v446_v59 }
  0x40   :  { %v497_v32 = vadd.s32 %v495_v11, %v493_v51  ;;  %v175_v42 = vadd.s32 %v1733_v55, %v1747_v60  ;;  %vm83_vm6 = vcmp.lt.s32.totalorder %v1649_v1, 0  ;;  %vm1795_vm8 = vcmp.le.f32.partialorder %v81_v3, 0.7853982 }
  0x41   :  { %vm184_vm3 = vcmp.lt.s32.totalorder %v183_v53, 0  ;;  %v185_v57 = vsub.s32 0, %v183_v53  ;;  %v476_v58 = vadd.s32 %v475_v56, %v465_v10  ;;  %v205_v28 = vsub.s32 4, %v1774_v43 }
  0x42   :  { %v498_v62 = vadd.s32 %v497_v32, %v487_v50  ;;  %vm409_vm10 = vcmp.lt.s32.totalorder %v1651_v2, 0  ;;  %vm1813_vm13 = vcmp.le.f32.partialorder %v407_v5, 0.7853982  ;;  %vm224_vm2 = vweird.f32 %v1649_v1 }
  0x43   :  { %v186_v63 = vsel %vm184_vm3, %v185_v57, %v183_v53  ;;  %v477_v21 = vadd.s32 %v476_v58, %v467_v54  ;;  %v206_v44 = vsel %vm83_vm6, %v205_v28, %v1774_v43 }
  0x44   :  { %v187_v61 = vclz %v186_v63  ;;  %v499_v0 = vadd.s32 %v498_v62, %v489_v22  ;;  %v208_v30 = vsel %vm1795_vm8, 0, %v206_v44 }
  0x45   :  { %vm502_vm4 = vc.u32 %v477_v21, %v496_v41  ;;  %v501_v3 = vadd.s32 %v496_v41, %v477_v21  ;;  %v379_v32 = vadd.s32 3, %v208_v30  ;;  %v225_v21 = vand.u32 3, %v208_v30 }
  0x46   :  { %v1432_v6 = vadd.s32 4294967294, %v187_v61  ;;  %v503_v7 = vadd.s32 1, %v499_v0 }
  0x47   :  { %v380_v61 = vand.u32 3, %v379_v32  ;;  %vm227_vm11 = vcmp.eq.s32.totalorder %v225_v21, 0  ;;  %vm230_vm12 = vcmp.eq.s32.totalorder %v225_v21, 2  ;;  %vm226_vm0 = vcmp.lt.s32.totalorder %v225_v21, 2 }
  0x48   :  { %vm1433_vm5 = vcmp.lt.s32.totalorder %v1432_v6, 0  ;;  %v504_v8 = vsel %vm502_vm4, %v503_v7, %v499_v0 }
  0x49   :  { %v190_v9 = vsel %vm1433_vm5, 0, %v1432_v6  ;;  %v505_v12 = vadd.s32 %v504_v8, %v500_v4  ;;  %vm382_vm14 = vcmp.eq.s32.totalorder %v380_v61, 0  ;;  %vm385_vm15 = vcmp.eq.s32.totalorder %v380_v61, 2 }
  0x4a   :  { %v191_v13 = vsub.s32 32, %v190_v9  ;;  %v192_v52 = vshll.u32 %v183_v53, %v190_v9  ;;  %v195_v14 = vsub.s32 4294967266, %v190_v9  ;;  %vm381_vm1 = vcmp.lt.s32.totalorder %v380_v61, 2 }
  0x4b   :  { %v506_v18 = vadd.s32 536870912, %v505_v12 }
  0x4c   :  { %v193_v15 = vshrl.u32 %v175_v42, %v191_v13  ;;  %v196_v16 = vadd.s32 127, %v195_v14  ;;  %v56_v13 = vld [vmem:[#allocation6 + $0x2] ss:$8 sm:$0x3] }
  0x4d   :  { %v1789_v17 = vshrl.u32 %v506_v18, 30 }
  0x4e   :  { %v194_v19 = vor.u32 %v193_v15, %v192_v52  ;;  %v197_v20 = vshll.u32 %v196_v16, 23  ;;  %v58_v52 = vld [vmem:[#allocation6 + $0x3] ss:$8 sm:$0x3] }
  0x4f   :  { %v508_v25 = vshll.u32 %v1789_v17, 30 }
  0x50   :  { %v198_v35 = vor.u32 4788187, %v197_v20  ;;  %v201_v23 = vcvt.s32.f32 %v194_v19  ;;  %v77_v20 = vmul.f32 %v56_v13, %v56_v13 }
  0x51   :  { %v509_v55 = vsub.s32 %v505_v12, %v508_v25  ;;  %v531_v12 = vsub.s32 4, %v1789_v17 }
  0x52   :  { %v199_v26 = vand.u32 2147483647, %v198_v35  ;;  %v79_v35 = vmul.f32 %v58_v52, %v58_v52 }
  0x53   :  { %vm510_vm7 = vcmp.lt.s32.totalorder %v509_v55, 0  ;;  %v511_v27 = vsub.s32 0, %v509_v55 }
  0x54   :  { %v202_v60 = vmul.f32 %v201_v23, %v199_v26  ;;  %v532_v23 = vsel %vm409_vm10, %v531_v12, %v1789_v17  ;;  %v1831_v17 = vld [vmem:[#allocation6 + $0x10] ss:$8 sm:$0x3] }
  0x55   :  { %v512_v33 = vsel %vm510_vm7, %v511_v27, %v509_v55 }
  0x56   :  { %v203_v31 = vxor.u32 2147483648, %v202_v60  ;;  %v513_v37 = vclz %v512_v33  ;;  %v80_v33 = vmul.f32 0.083333336, %v79_v35 }
  0x58   :  { %v204_v36 = vsel %vm83_vm6, %v203_v31, %v202_v60  ;;  %v1438_v24 = vadd.s32 4294967294, %v513_v37  ;;  %v534_v60 = vsel %vm1813_vm13, 0, %v532_v23  ;;  %v78_v31 = vmul.f32 0.083333336, %v77_v20 }
  0x59   :  { %v207_v38 = vsel %vm1795_vm8, %v1649_v1, %v204_v36  ;;  %v551_v30 = vand.u32 3, %v534_v60 }
  0x5a   :  { %v209_v40 = vmul.f32 %v207_v38, %v207_v38  ;;  %vm1439_vm9 = vcmp.lt.s32.totalorder %v1438_v24, 0  ;;  %v400_v44 = vsub.f32 %v78_v31, %v80_v33 }
  0x5b   :  { %v516_v45 = vsel %vm1439_vm9, 0, %v1438_v24  ;;  %v1829_v24 = vld [vmem:[#allocation6 + $0x7] ss:$8 sm:$0x3]  ;;  %vm556_vm3 = vcmp.eq.s32.totalorder %v551_v30, 2  ;;  %vm552_vm5 = vcmp.lt.s32.totalorder %v551_v30, 2  ;;  %vm550_vm9 = vweird.f32 %v1651_v2 }
  0x5c   :  { %v210_v46 = vmul.f32 -0.001358992, %v209_v40  ;;  %v217_v34 = vmul.f32 -0.00019511016, %v209_v40  ;;  %v517_v48 = vsub.s32 32, %v516_v45  ;;  %v518_v10 = vshll.u32 %v509_v55, %v516_v45 }
  0x5d   :  { %v521_v49 = vsub.s32 4294967266, %v516_v45  ;;  %vm553_vm6 = vcmp.eq.s32.totalorder %v551_v30, 0  ;;  %v1868_v30 = vld [vmem:[#allocation3 + $0x30] sm:$0xff] }
  0x5e   :  { %v211_v39 = vadd.f32 0.041655596, %v210_v46  ;;  %v218_v47 = vadd.f32 0.008332121, %v217_v34  ;;  %v519_v53 = vshrl.u32 %v501_v3, %v517_v48 }
  0x5f   :  { %v522_v54 = vadd.s32 127, %v521_v49  ;;  %v405_v49 = vmul.f32 %v1831_v17, %v1831_v17 }
  0x60   :  { %v212_v50 = vmul.f32 %v211_v39, %v209_v40  ;;  %v219_v51 = vmul.f32 %v218_v47, %v209_v40  ;;  %v520_v22 = vor.u32 %v519_v53, %v518_v10  ;;  %v403_v10 = vmul.f32 %v1829_v24, %v1829_v24 }
  0x61   :  { %v523_v57 = vshll.u32 %v522_v54, 23 }
  0x62   :  { %v213_v56 = vadd.f32 -0.4999988, %v212_v50  ;;  %v220_v11 = vadd.f32 -0.16666654, %v219_v51  ;;  %v527_v59 = vcvt.s32.f32 %v520_v22 }
  0x63   :  { %v524_v41 = vor.u32 4788187, %v523_v57 }
  0x64   :  { %v214_v58 = vmul.f32 %v213_v56, %v209_v40  ;;  %v221_v43 = vmul.f32 %v220_v11, %v209_v40  ;;  %v705_v40 = vadd.s32 3, %v534_v60 }
  0x65   :  { %v525_v0 = vand.u32 2147483647, %v524_v41  ;;  %v406_v41 = vmul.f32 0.083333336, %v405_v49 }
  0x66   :  { %v215_v62 = vadd.f32 1.0, %v214_v58  ;;  %v222_v63 = vadd.f32 1.0, %v221_v43  ;;  %v706_v50 = vand.u32 3, %v705_v40  ;;  %v404_v43 = vmul.f32 0.083333336, %v403_v10  ;;  %v1850_v40 = vld [vmem:[#allocation3 + $0x18] sm:$0xff] }
  0x67   :  { %v528_v7 = vmul.f32 %v527_v59, %v525_v0 }
  0x68   :  { %v223_v4 = vmul.f32 %v222_v63, %v207_v38  ;;  %v231_v6 = vxor.u32 2147483648, %v215_v62  ;;  %vm711_vm4 = vcmp.eq.s32.totalorder %v706_v50, 2  ;;  %vm707_vm7 = vcmp.lt.s32.totalorder %v706_v50, 2 }
  0x69   :  { %v529_v9 = vxor.u32 2147483648, %v528_v7  ;;  %vm708_vm8 = vcmp.eq.s32.totalorder %v706_v50, 0  ;;  %v726_v8 = vsub.f32 %v404_v43, %v406_v41 }
  0x6a   :  { %v228_v42 = vxor.u32 2147483648, %v223_v4  ;;  %v232_v14 = vsel %vm230_vm12, %v231_v6, %v223_v4  ;;  %v387_v19 = vsel %vm385_vm15, %v231_v6, %v223_v4 }
  0x6b   :  { %v530_v15 = vsel %vm409_vm10, %v529_v9, %v528_v7 }
  0x6c   :  { %v229_v16 = vsel %vm227_vm11, %v215_v62, %v228_v42  ;;  %v384_v18 = vsel %vm382_vm14, %v215_v62, %v228_v42  ;;  %v533_v5 = vsel %vm1813_vm13, %v1651_v2, %v530_v15 }
  0x6d   :  { %v535_v25 = vmul.f32 %v533_v5, %v533_v5  ;;  %v233_v26 = vsel %vm226_vm0, %v229_v16, %v232_v14  ;;  %v388_v55 = vsel %vm381_vm1, %v384_v18, %v387_v19 }
  0x6e   :  { %v234_v36 = vsel %vm224_vm2, nan, %v233_v26  ;;  %v389_v37 = vsel %vm224_vm2, nan, %v388_v55 }
  0x6f   :  { %v536_v27 = vmul.f32 -0.001358992, %v535_v25  ;;  %v543_v29 = vmul.f32 -0.00019511016, %v535_v25  ;;  %v390_v34 = vmul.f32 %v234_v36, %v78_v31  ;;  %v392_v3 = vmul.f32 %v389_v37, %v80_v33 }
  0x70   :  { %v395_v45 = vmul.f32 %v389_v37, %v78_v31  ;;  %v397_v39 = vmul.f32 %v234_v36, %v80_v33  ;;  %v401_v11 = vmul.f32 %v400_v44, %v234_v36 }
  0x71   :  { %v537_v28 = vadd.f32 0.041655596, %v536_v27  ;;  %v544_v38 = vadd.f32 0.008332121, %v543_v29  ;;  %v391_v54 = vmul.f32 %v390_v34, %v234_v36  ;;  %v393_v56 = vmul.f32 %v392_v3, %v389_v37  ;;  %v1856_v3 = vld [vmem:[#allocation3 + $0x38] sm:$0xff] }
  0x72   :  { %v396_v22 = vmul.f32 %v395_v45, %v389_v37  ;;  %v398_v32 = vmul.f32 %v397_v39, %v234_v36  ;;  %v1839_v21 = vmul.f32 %v401_v11, %v389_v37  ;;  %v1858_v45 = vld [vmem:[#allocation3] sm:$0xff]  ;;  %v1860_v39 = vld [vmem:[#allocation3 + $0x10] sm:$0xff] }
  0x73   :  { %v538_v46 = vmul.f32 %v537_v28, %v535_v25  ;;  %v545_v1 = vmul.f32 %v544_v38, %v535_v25  ;;  %v1837_v63 = vadd.f32 %v393_v56, %v391_v54  ;;  %v1848_v38 = vld [vmem:[#allocation3 + $0x8] sm:$0xff]  ;;  %v843_v10 = vmax.f32 %v1858_v45, %v1860_v39 }
  0x74   :  { %v1841_v61 = vadd.f32 %v398_v32, %v396_v22  ;;  %v752_v15 = vmul.f32 %v1839_v21, %v1839_v21  ;;  %v850_v34 = vmax.f32 %v1848_v38, %v1850_v40 }
  0x75   :  { %v539_v47 = vadd.f32 -0.4999988, %v538_v46  ;;  %v546_v48 = vadd.f32 -0.16666654, %v545_v1  ;;  %v1852_v46 = vld [vmem:[#allocation3 + $0x28] sm:$0xff]  ;;  %v844_v54 = vrot.slane %v843_v10, 4 }
  0x76   :  { %v751_v14 = vmul.f32 %v1841_v61, %v1837_v63  ;;  %v851_v49 = vrot.slane %v850_v34, 4 }
  0x77   :  { %v540_v51 = vmul.f32 %v539_v47, %v535_v25  ;;  %v547_v53 = vmul.f32 %v546_v48, %v535_v25  ;;  %v1862_v47 = vld [vmem:[#allocation3 + $0x20] sm:$0xff]  ;;  %v979_v48 = vmax.f32 %v1852_v46, %v1856_v3 }
  0x78   :  { %v753_v27 = vsub.f32 %v751_v14, %v752_v15  ;;  %v852_v56 = vmax.f32 %v850_v34, %v851_v49 }
  0x79   :  { %v541_v57 = vadd.f32 1.0, %v540_v51  ;;  %v548_v58 = vadd.f32 1.0, %v547_v53  ;;  %v972_v51 = vmax.f32 %v1862_v47, %v1868_v30  ;;  %v980_v53 = vrot.slane %v979_v48, 4 }
  0x7a   :  { %v754_v33 = vmax.f32 %v753_v27, 0.0 }
  0x7b   :  { %v549_v59 = vmul.f32 %v548_v58, %v533_v5  ;;  %v557_v62 = vxor.u32 2147483648, %v541_v57  ;;  %v973_v22 = vrot.slane %v972_v51, 4  ;;  %v981_v32 = vmax.f32 %v979_v48, %v980_v53 }
  0x7c   :  { %v853_v58 = vrot.slane %v852_v56, 2 }
  0x7d   :  { %v554_v0 = vxor.u32 2147483648, %v549_v59  ;;  %v558_v4 = vsel %vm556_vm3, %v557_v62, %v549_v59  ;;  %v713_v6 = vsel %vm711_vm4, %v557_v62, %v549_v59 }
  0x7e   :  { %v854_v62 = vmax.f32 %v852_v56, %v853_v58 }
  0x7f   :  { %v555_v7 = vsel %vm553_vm6, %v541_v57, %v554_v0  ;;  %v710_v42 = vsel %vm708_vm8, %v541_v57, %v554_v0  ;;  %v845_v57 = vmax.f32 %v843_v10, %v844_v54  ;;  %v1900_v54 = vld [vmem:[#allocation6 + $0x12] ss:$8 sm:$0x3] }
  0x80   :  { %v559_v9 = vsel %vm552_vm5, %v555_v7, %v558_v4  ;;  %v714_v12 = vsel %vm707_vm7, %v710_v42, %v713_v6  ;;  %v982_v4 = vrot.slane %v981_v32, 2  ;;  %v855_v42 = vrot.slane %v854_v62, 1 }
  0x81   :  { %v560_v13 = vsel %vm550_vm9, nan, %v559_v9  ;;  %v715_v52 = vsel %vm550_vm9, nan, %v714_v12  ;;  %v846_v59 = vrot.slane %v845_v57, 2 }
  0x82   :  { %v716_v16 = vmul.f32 %v560_v13, %v404_v43  ;;  %v718_v18 = vmul.f32 %v715_v52, %v406_v41  ;;  %v721_v19 = vmul.f32 %v715_v52, %v404_v43  ;;  %v723_v5 = vmul.f32 %v560_v13, %v406_v41 }
  0x83   :  { %v727_v20 = vmul.f32 %v726_v8, %v560_v13  ;;  %v974_v41 = vmax.f32 %v972_v51, %v973_v22  ;;  %v847_v7 = vmax.f32 %v845_v57, %v846_v59 }
  0x84   :  { %v717_v35 = vmul.f32 %v716_v16, %v560_v13  ;;  %v719_v2 = vmul.f32 %v718_v18, %v715_v52  ;;  %v722_v23 = vmul.f32 %v721_v19, %v715_v52  ;;  %v724_v25 = vmul.f32 %v723_v5, %v560_v13 }
  0x85   :  { %v728_v26 = vmul.f32 %v727_v20, %v715_v52  ;;  %v975_v9 = vrot.slane %v974_v41, 2  ;;  %v848_v13 = vrot.slane %v847_v7, 1  ;;  %v1875_v52 = vmax.f32 %v854_v62, %v855_v42 }
  0x86   :  { %v720_v55 = vadd.f32 %v719_v2, %v717_v35  ;;  %v725_v60 = vadd.f32 %v724_v25, %v722_v23  ;;  %v983_v18 = vmax.f32 %v981_v32, %v982_v4  ;;  %v52_v23 = vld [vmem:[#allocation6] ss:$8 sm:$0x3]  ;;  %v54_v25 = vld [vmem:[#allocation6 + $0x1] ss:$8 sm:$0x3] }
  0x87   :  { %v756_v29 = vmul.f32 %v728_v26, %v728_v26  ;;  %v1873_v12 = vadd.f32 %v728_v26, %v1839_v21  ;;  %v1879_v5 = vmax.f32 %v847_v7, %v848_v13  ;;  %v858_v20 = vsub.f32 %v1848_v38, %v1875_v52 }
  0x88   :  { %v755_v31 = vmul.f32 %v725_v60, %v720_v55  ;;  %v731_v14 = vadd.f32 %v720_v55, %v1837_v63  ;;  %v732_v15 = vadd.f32 %v725_v60, %v1841_v61  ;;  %v860_v35 = vsub.f32 %v1850_v40, %v1875_v52  ;;  %v1889_v55 = vld [vmem:[#allocation6 + $0x5] ss:$8 sm:$0x3] }
  0x89   :  { %v976_v2 = vmax.f32 %v974_v41, %v975_v9  ;;  %v857_v63 = vsub.f32 %v1858_v45, %v1879_v5  ;;  %v859_v61 = vsub.f32 %v1860_v39, %v1879_v5  ;;  %v735_v27 = vmul.f32 %v1873_v12, %v1873_v12 }
  0x8a   :  { %v757_v36 = vsub.f32 %v755_v31, %v756_v29  ;;  %v862_v26 = vpack.c.bf16 %v860_v35, %v858_v20  ;;  %v733_v60 = vmul.f32 %v732_v15, %v731_v14  ;;  %v1893_v31 = vld [vmem:[#allocation6 + $0x6] ss:$8 sm:$0x3]  ;;  %v729_v34 = vsub.f32 %v52_v23, %v1889_v55 }
  0x8b   :  { %v730_v49 = vsub.f32 %v54_v25, %v1893_v31 }
  0x8c   :  { %v758_v37 = vmax.f32 %v757_v36, 0.0  ;;  %v864_v36 = vunpack.c.l.bf16 %v862_v26  ;;  %v741_v59 = vmul.f32 %v732_v15, %v729_v34 }
  0x8d   :  { %v739_v41 = vmul.f32 %v731_v14, %v730_v49 }
  0x8e   :  { %v759_v28 = vmul.f32 %v758_v37, %v754_v33  ;;  %v861_v33 = vpack.c.bf16 %v859_v61, %v857_v63  ;;  %v866_v37 = vunpack.c.h.bf16 %v862_v26  ;;  %v869_v51 = vmul.f32 1.442695, %v864_v36 }
  0x8f   :  { %v740_v35 = vmul.f32 %v739_v41, %v730_v49 }
  0x90   :  { %1469 = vrsqrt.f32 %v759_v28  ;;  %vm767_vm10 = vcmp.eq.f32.partialorder %v759_v28, inf  ;;  %v770_v6 = vand.u32 2147483648, %v759_v28  ;;  %vm769_vm11 = vcmp.eq.f32.partialorder %v759_v28, 0.0 }
  0x91   :  { %v863_v48 = vunpack.c.l.bf16 %v861_v33  ;;  %v865_v10 = vunpack.c.h.bf16 %v861_v33  ;;  %v873_v53 = vmul.f32 1.442695, %v866_v37 }
  0x93   :  { %v867_v22 = vmul.f32 1.442695, %v863_v48  ;;  %v871_v32 = vmul.f32 1.442695, %v865_v10 }
  0x96   :  { %v1470_v1 = vpop.eup %1469 }
  0x97   :  { %v761_v44 = vmul.f32 %v1470_v1, %v759_v28 }
  0x99   :  { %v762_v50 = vmul.f32 %v1470_v1, %v761_v44  ;;  %v1897_v44 = vmul.f32 0.5, %v1829_v24  ;;  %v746_v24 = vsub.f32 0.0, %v729_v34 }
  0x9b   :  { %v763_v11 = vmul.f32 0.5, %v762_v50  ;;  %v736_v50 = vsub.f32 %v733_v60, %v735_v27  ;;  %v823_v56 = vsub.f32 %v1889_v55, %v1897_v44 }
  0x9d   :  { %v764_v43 = vsub.f32 1.5, %v763_v11 }
  0x9f   :  { %v765_v0 = vmul.f32 %v1470_v1, %v764_v43  ;;  %v977_v1 = vrot.slane %v976_v2, 1  ;;  %v737_v43 = vadd.f32 1e-07, %v736_v50 }
  0xa1   :  { %v766_v8 = vmul.f32 %v765_v0, %v759_v28  ;;  %v1906_v57 = vmax.f32 %v976_v2, %v977_v1  ;;  %v828_v0 = vsub.f32 %v1900_v54, %v823_v56 }
  0xa3   :  { %v768_v16 = vsel %vm767_vm10, %v759_v28, %v766_v8  ;;  %v984_v28 = vrot.slane %v983_v18, 1  ;;  %v986_v7 = vsub.f32 %v1862_v47, %v1906_v57  ;;  %v988_v42 = vsub.f32 %v1868_v30, %v1906_v57 }
  0xa4   :  { %v771_v19 = vsel %vm769_vm11, %v770_v6, %v768_v16  ;;  %v747_v16 = vmul.f32 %v746_v24, %v1873_v12 }
  0xa5   :  { %v772_v21 = vmul.f32 4.0, %v771_v19  ;;  %v1904_v11 = vmax.f32 %v983_v18, %v984_v28  ;;  %v832_v19 = vmax.f32 %v828_v0, 0.0  ;;  %v990_v23 = vpack.c.bf16 %v988_v42, %v986_v7 }
  0xa6   :  { %v748_v36 = vmul.f32 %v747_v16, %v730_v49 }
  0xa7   :  { %v773_v29 = vadd.f32 1e-07, %v772_v21  ;;  %v987_v4 = vsub.f32 %v1852_v46, %v1904_v11  ;;  %v989_v8 = vsub.f32 %v1856_v3, %v1904_v11  ;;  %v742_v21 = vmul.f32 %v741_v59, %v729_v34  ;;  %v1923_v59 = vld [vmem:[#allocation6 + $0x13] ss:$8 sm:$0x3] }
  0xa8   :  { %v833_v33 = vmin.f32 %v832_v19, 14.99  ;;  %v992_v28 = vunpack.c.l.bf16 %v990_v23  ;;  %v994_v10 = vunpack.c.h.bf16 %v990_v23 }
  0xa9   :  { %1471 = vrcp.f32 %v773_v29  ;;  %v785_v6 = vand.u32 2147483648, %v773_v29  ;;  %vm779_vm12 = vweird.f32 %v773_v29  ;;  %v783_v13 = vand.u32 2147483647, %v773_v29 }
  0xaa   :  { %1473 = vpow2.f32 %v869_v51  ;;  %v991_v61 = vpack.c.bf16 %v989_v8, %v987_v4  ;;  %v743_v12 = vadd.f32 %v742_v21, %v740_v35  ;;  %v996_v49 = vmul.f32 1.442695, %v992_v28  ;;  %v1929_v21 = vld [vmem:[#allocation3 + $0x40] sm:$0xff] }
  0xab   :  { %1475 = vpow2.f32 %v873_v53  ;;  %v786_v2 = vor.u32 1.1754944e-38, %v785_v6  ;;  %vm784_vm15 = vcmp.eq.f32.partialorder %v783_v13, 8.507059e+37  ;;  %v1000_v6 = vmul.f32 1.442695, %v994_v10 }
  0xac   :  { %1477 = vpow2.f32 %v867_v22  ;;  %v993_v48 = vunpack.c.l.bf16 %v991_v61 }
  0xad   :  { %1479 = vpow2.f32 %v871_v32 }
  0xae   :  { %1481 = vrcp.f32 %v737_v43 }
  0xaf   :  { %v1472_v58 = vpop.eup %1471 }
  0xb0   :  { %v775_v62 = vmul.f32 %v1472_v58, %v773_v29  ;;  %vm780_vm13 = vweird.f32 %v1472_v58  ;;  %v1474_v14 = vpop.eup %1473  ;;  %v1919_v29 = vmul.f32 0.5, %v1831_v17  ;;  %v995_v17 = vunpack.c.h.bf16 %v991_v61 }
  0xb1   :  { %v1476_v15 = vpop.eup %1475  ;;  %vm781_vm14 = vmor %vm779_vm12, %vm780_vm13 }
  0xb2   :  { %v776_v9 = vsub.f32 1.0, %v775_v62  ;;  %v1478_v20 = vpop.eup %1477  ;;  %v876_v60 = vpack.c.bf16 %v1476_v15, %v1474_v14  ;;  %v825_v24 = vsub.f32 %v1893_v31, %v1919_v29  ;;  %v817_v62 = vlaneseq }
  0xb3   :  { %v1480_v25 = vpop.eup %1479  ;;  %v1002_v8 = vmul.f32 1.442695, %v995_v17 }
  0xb4   :  { %v777_v18 = vmul.f32 %v1472_v58, %v776_v9  ;;  %v875_v26 = vpack.c.bf16 %v1480_v25, %v1478_v20  ;;  %v1482_v1 = vpop.eup %1481  ;;  %v878_v53 = vunpack.c.l.bf16 %v876_v60  ;;  %v880_v22 = vunpack.c.h.bf16 %v876_v60 }
  0xb5   :  { %v744_v43 = vmul.f32 %v1482_v1, %v743_v12  ;;  %v749_v41 = vmul.f32 %v1482_v1, %v748_v36  ;;  %v829_v7 = vsub.f32 %v1923_v59, %v825_v24  ;;  %v1927_v15 = vshrl.u32 %v817_v62, 7 }
  0xb6   :  { %v778_v63 = vadd.f32 %v1472_v58, %v777_v18  ;;  %v877_v51 = vunpack.c.l.bf16 %v875_v26  ;;  %v879_v56 = vunpack.c.h.bf16 %v875_v26  ;;  %v888_v4 = vadd.f32 %v880_v22, %v878_v53 }
  0xb7   :  { %v745_v9 = vmul.f32 0.25, %v744_v43  ;;  %v750_v13 = vmul.f32 0.5, %v749_v41  ;;  %v961_v35 = vmax.f32 %v829_v7, 0.0  ;;  %v1934_v26 = vadd.s32 8, %v1927_v15 }
  0xb8   :  { %v782_v27 = vsel %vm781_vm14, %v1472_v58, %v778_v63  ;;  %v834_v58 = vfloor.f32 %v833_v33  ;;  %v881_v0 = vadd.f32 %v879_v56, %v877_v51  ;;  %v889_v18 = vrot.slane %v888_v4, 4 }
  0xb9   :  { %v787_v37 = vsel %vm784_vm15, %v786_v2, %v782_v27  ;;  %v1931_v2 = vld [vmem:[#allocation3 + $0x50] sm:$0xff]  ;;  %v793_v25 = vadd.f32 %v750_v13, %v745_v9  ;;  %v1942_v1 = vadd.f32 %v1897_v44, %v1889_v55  ;;  %v1944_v10 = vmin.f32 %v961_v35, 14.99 }
  0xba   :  { %v788_v34 = vmul.f32 %v787_v37, %v736_v50  ;;  %v998_v50 = vmul.f32 1.442695, %v993_v48  ;;  %v835_v42 = vadd.f32 1.0, %v834_v58  ;;  %v1444_v14 = vcvt.f32.s32 %v834_v58 }
  0xbb   :  { %v882_v16 = vrot.slane %v881_v0, 4  ;;  %v890_v37 = vadd.f32 %v889_v18, %v888_v4 }
  0xbc   :  { %v789_v32 = vadd.f32 1e-07, %v788_v34  ;;  %v836_v20 = vsub.f32 %v835_v42, %v833_v33  ;;  %v905_v63 = vperm.slane %v1444_v14, 1  ;;  %v919_v61 = vadd.s32 1, %v1444_v14 }
  0xbd   :  { %v904_v60 = vperm.slane %v1444_v14, 0  ;;  %v883_v36 = vadd.f32 %v882_v16, %v881_v0  ;;  %v1938_v33 = vmax.f32 %v1929_v21, %v1931_v2 }
  0xbe   :  { %1483 = vlog2.f32 %v789_v32  ;;  %v837_v34 = vsub.f32 1.0, %v836_v20  ;;  %v920_v48 = vperm.slane %v919_v61, 0  ;;  %vm1947_vm0 = vcmp.eq.s32.totalorder %v1927_v15, %v905_v63 }
  0xbf   :  { %1485 = vpow2.f32 %v996_v49  ;;  %v912_v22 = vperm.slane %v836_v20, 1  ;;  %v921_v32 = vperm.slane %v919_v61, 1  ;;  %vm1952_vm1 = vcmp.eq.s32.totalorder %v1927_v15, %v904_v60 }
  0xc0   :  { %1487 = vpow2.f32 %v998_v50  ;;  %vm1957_vm2 = vcmp.eq.s32.totalorder %v1934_v26, %v904_v60  ;;  %vm1962_vm3 = vcmp.eq.s32.totalorder %v1934_v26, %v905_v63  ;;  %v911_v17 = vperm.slane %v836_v20, 0 }
  0xc1   :  { %1489 = vpow2.f32 %v1000_v6  ;;  %v884_v41 = vrot.slane %v883_v36, 2  ;;  %v891_v49 = vrot.slane %v890_v37, 2  ;;  %v927_v50 = vperm.slane %v837_v34, 0 }
  0xc2   :  { %1491 = vpow2.f32 %v1002_v8  ;;  %vm1967_vm4 = vcmp.eq.s32.totalorder %v1927_v15, %v920_v48  ;;  %vm1972_vm5 = vcmp.eq.s32.totalorder %v1934_v26, %v920_v48  ;;  %v928_v6 = vperm.slane %v837_v34, 1 }
  0xc3   :  { %vm1977_vm6 = vcmp.eq.s32.totalorder %v1927_v15, %v921_v32  ;;  %vm1982_vm7 = vcmp.eq.s32.totalorder %v1934_v26, %v921_v32  ;;  %v915_v14 = vsel %vm1952_vm1, %v911_v17, 0.0  ;;  %v916_v16 = vsel %vm1947_vm0, %v912_v22, 0.0 }
  0xc4   :  { %v1484_v19 = vpop.eup %1483  ;;  %v917_v18 = vsel %vm1957_vm2, %v911_v17, 0.0  ;;  %v892_v35 = vadd.f32 %v891_v49, %v890_v37  ;;  %v885_v63 = vadd.f32 %v884_v41, %v883_v36  ;;  %v932_v61 = vsel %vm1977_vm6, %v928_v6, 0.0 }
  0xc5   :  { %v791_v23 = vmul.f32 0.6931472, %v1484_v19  ;;  %v1486_v27 = vpop.eup %1485  ;;  %v918_v19 = vsel %vm1962_vm3, %v912_v22, 0.0  ;;  %v934_v60 = vsel %vm1982_vm7, %v928_v6, 0.0  ;;  %v936_v22 = vadd.f32 %v932_v61, %v916_v16 }
  0xc6   :  { %v1488_v28 = vpop.eup %1487  ;;  %v893_v56 = vrot.slane %v892_v35, 1  ;;  %v938_v32 = vadd.f32 %v934_v60, %v918_v19  ;;  %v886_v36 = vrot.slane %v885_v63, 1  ;;  %v1099_v44 = vrot.slane %v1938_v33, 4 }
  0xc7   :  { %v792_v12 = vmul.f32 0.5, %v791_v23  ;;  %v1490_v51 = vpop.eup %1489  ;;  %v931_v23 = vsel %vm1967_vm4, %v927_v50, 0.0  ;;  %v2010_v49 = vadd.f32 %v1919_v29, %v1893_v31  ;;  %v940_v0 = vmul.f32 %v936_v22, %v1848_v38  ;;  %v2018_v31 = vld [vmem:[#allocation3 + $0x48] sm:$0xff]  ;;  %v2020_v29 = vld [vmem:[#allocation3 + $0x58] sm:$0xff] }
  0xc8   :  { %v1492_v24 = vpop.eup %1491  ;;  %v1004_v7 = vpack.c.bf16 %v1490_v51, %v1486_v27  ;;  %v935_v51 = vadd.f32 %v931_v23, %v915_v14  ;;  %v942_v4 = vmul.f32 %v938_v32, %v1850_v40  ;;  %v887_v6 = vadd.f32 %v886_v36, %v885_v63 }
  0xc9   :  { %v794_v53 = vadd.f32 %v793_v25, %v792_v12  ;;  %v1005_v13 = vpack.c.bf16 %v1492_v24, %v1488_v28  ;;  %v933_v25 = vsel %vm1972_vm5, %v927_v50, 0.0  ;;  %v830_v24 = vsub.f32 %v1942_v1, %v1900_v54 }
  0xca   :  { %v1006_v27 = vunpack.c.l.bf16 %v1004_v7  ;;  %v1008_v34 = vunpack.c.h.bf16 %v1004_v7  ;;  %v937_v37 = vadd.f32 %v933_v25, %v917_v18  ;;  %v939_v17 = vmul.f32 %v935_v51, %v1858_v45 }
  0xcb   :  { %v795_v43 = vmax.f32 %v794_v53, 1e-07  ;;  %v1007_v28 = vunpack.c.l.bf16 %v1005_v13  ;;  %v1009_v48 = vunpack.c.h.bf16 %v1005_v13  ;;  %v963_v53 = vfloor.f32 %v1944_v10 }
  0xcc   :  { %v1010_v58 = vadd.f32 %v1008_v34, %v1006_v27  ;;  %v894_v50 = vadd.f32 %v893_v56, %v892_v35  ;;  %v1100_v45 = vmax.f32 %v1938_v33, %v1099_v44  ;;  %v831_v38 = vsub.f32 %v2010_v49, %v1923_v59  ;;  %v2145_v49 = vld [vmem:[#allocation3 + $0x68] sm:$0xff] }
  0xcd   :  { %v796_v42 = vmin.f32 %v795_v43, 100.0  ;;  %v1017_v55 = vadd.f32 %v1009_v48, %v1007_v28  ;;  %v941_v43 = vmul.f32 %v937_v37, %v1860_v39  ;;  %v964_v41 = vadd.f32 1.0, %v963_v53 }
  0xce   :  { %v1011_v1 = vrot.slane %v1010_v58, 4  ;;  %v1446_v13 = vcvt.f32.s32 %v963_v53  ;;  %v950_v40 = vadd.f32 %v942_v4, %v940_v0  ;;  %vm2094_vm0 = vcmp.lt.s32.totalorder %v817_v62, 256 }
  0xcf   :  { %v797_v20 = vsub.f32 0.0, %v796_v42  ;;  %v1018_v7 = vrot.slane %v1017_v55, 4  ;;  %v2014_v42 = vmax.f32 %v830_v24, 0.0  ;;  %v943_v39 = vadd.f32 %v941_v43, %v939_v17 }
  0xd0   :  { %v965_v9 = vsub.f32 %v964_v41, %v1944_v10  ;;  %v1030_v16 = vperm.slane %v1446_v13, 0  ;;  %v1031_v18 = vperm.slane %v1446_v13, 1  ;;  %v1012_v33 = vadd.f32 %v1011_v1, %v1010_v58 }
  0xd1   :  { %v798_v12 = vmul.f32 1.442695, %v797_v20  ;;  %v1019_v19 = vadd.f32 %v1018_v7, %v1017_v55  ;;  %v1101_v20 = vrot.slane %v1100_v45, 2  ;;  %v1105_v10 = vmax.f32 %v2018_v31, %v2020_v29 }
  0xd2   :  { %v944_v35 = vrot.slane %v943_v39, 4  ;;  %v966_v23 = vsub.f32 1.0, %v965_v9  ;;  %v1088_v25 = vmin.f32 %v2014_v42, 14.99  ;;  %v951_v63 = vrot.slane %v950_v40, 4 }
  0xd3   :  { %1493 = vpow2.f32 %v798_v12  ;;  %v1037_v61 = vperm.slane %v965_v9, 0  ;;  %v1038_v60 = vperm.slane %v965_v9, 1  ;;  %v1045_v27 = vadd.s32 1, %v1446_v13 }
  0xd4   :  { %1495 = vlog2.f32 %v894_v50  ;;  %vm1032_vm8 = vcmp.eq.s32.totalorder %v1927_v15, %v1030_v16  ;;  %vm1033_vm9 = vcmp.eq.s32.totalorder %v1927_v15, %v1031_v18  ;;  %v1102_v12 = vmax.f32 %v1100_v45, %v1101_v20 }
  0xd5   :  { %1497 = vlog2.f32 %v887_v6  ;;  %v1106_v28 = vrot.slane %v1105_v10, 4  ;;  %v1013_v48 = vrot.slane %v1012_v33, 2  ;;  %v1020_v51 = vrot.slane %v1019_v19, 2 }
  0xd6   :  { %vm1034_vm10 = vcmp.eq.s32.totalorder %v1934_v26, %v1030_v16  ;;  %v1046_v37 = vperm.slane %v1045_v27, 0  ;;  %v2037_v56 = vadd.f32 %v944_v35, %v943_v39  ;;  %vm2040_vm11 = vcmp.eq.s32.totalorder %v1934_v26, %v1031_v18  ;;  %v2111_v16 = vld [vmem:[#allocation3 + $0x60] sm:$0xff] }
  0xd7   :  { %v1103_v32 = vrot.slane %v1102_v12, 1  ;;  %v1107_v36 = vmax.f32 %v1105_v10, %v1106_v28  ;;  %v2044_v24 = vadd.f32 %v951_v63, %v950_v40  ;;  %v1041_v58 = vsel %vm1032_vm8, %v1037_v61, 0.0 }
  0xd8   :  { %v1042_v55 = vsel %vm1033_vm9, %v1038_v60, 0.0  ;;  %v1047_v44 = vperm.slane %v1045_v27, 1  ;;  %v1043_v43 = vsel %vm1034_vm10, %v1037_v61, 0.0  ;;  %v1053_v41 = vperm.slane %v966_v23, 0 }
  0xd9   :  { %v1494_v54 = vpop.eup %1493  ;;  %v2046_v50 = vmax.f32 %v1102_v12, %v1103_v32  ;;  %v1108_v0 = vrot.slane %v1107_v36, 2  ;;  %v2049_v6 = vadd.f32 %v1013_v48, %v1012_v33  ;;  %vm2054_vm12 = vcmp.eq.s32.totalorder %v1927_v15, %v1046_v37 }
  0xda   :  { %v800_v8 = vsub.f32 1.0, %v1494_v54  ;;  %v2032_v34 = vpop.eup %1495  ;;  %v2051_v54 = vadd.f32 %v1020_v51, %v1019_v19  ;;  %v1054_v7 = vperm.slane %v966_v23, 1  ;;  %v1044_v13 = vsel %vm2040_vm11, %v1038_v60, 0.0 }
  0xdb   :  { %v2035_v53 = vpop.eup %1497  ;;  %v1109_v45 = vmax.f32 %v1107_v36, %v1108_v0  ;;  %v1114_v39 = vsub.f32 %v1931_v2, %v2046_v50  ;;  %vm2065_vm13 = vcmp.eq.s32.totalorder %v1927_v15, %v1047_v44  ;;  %vm2070_vm14 = vcmp.eq.s32.totalorder %v1934_v26, %v1046_v37 }
  0xdc   :  { %v2024_v14 = vadd.f32 1e-07, %v800_v8  ;;  %v1112_v8 = vsub.f32 %v1929_v21, %v2046_v50  ;;  %vm2075_vm15 = vcmp.eq.s32.totalorder %v1934_v26, %v1047_v44  ;;  %v1057_v33 = vsel %vm2054_vm12, %v1053_v41, 0.0 }
  0xdd   :  { %v1110_v19 = vrot.slane %v1109_v45, 1  ;;  %v1015_v35 = vrot.slane %v2049_v6, 1  ;;  %v1022_v23 = vrot.slane %v2051_v54, 1  ;;  %v1089_v63 = vfloor.f32 %v1088_v25 }
  0xde   :  { %1499 = vrsqrt.f32 %v2024_v14  ;;  %v1116_v20 = vpack.c.bf16 %v1114_v39, %v1112_v8  ;;  %v1058_v61 = vsel %vm2065_vm13, %v1054_v7, 0.0  ;;  %v1059_v48 = vsel %vm2070_vm14, %v1053_v41, 0.0  ;;  %v2106_v39 = vld [vmem:[#allocation6 + $0x14] ss:$8 sm:$0x3] }
  0xdf   :  { %v2087_v60 = vmax.f32 %v1109_v45, %v1110_v19  ;;  %v1060_v51 = vsel %vm2075_vm15, %v1054_v7, 0.0  ;;  %v1061_v37 = vadd.f32 %v1057_v33, %v1041_v58  ;;  %v1062_v1 = vadd.f32 %v1058_v61, %v1042_v55  ;;  %v814_v33 = vld [vmem:[#allocation2] ss:$2 sm:$0x3] }
  0xe0   :  { %v1118_v27 = vunpack.c.l.bf16 %v1116_v20  ;;  %v1120_v12 = vunpack.c.h.bf16 %v1116_v20  ;;  %v1090_v41 = vadd.f32 1.0, %v1089_v63  ;;  %v1448_v45 = vcvt.f32.s32 %v1089_v63 }
  0xe1   :  { %v1113_v32 = vsub.f32 %v2018_v31, %v2087_v60  ;;  %v1115_v36 = vsub.f32 %v2020_v29, %v2087_v60  ;;  %vm809_vm1 = vcmp.eq.f32.partialorder %v2024_v14, inf  ;;  %v812_v58 = vand.u32 2147483648, %v2024_v14 }
  0xe2   :  { %v1122_v44 = vmul.f32 1.442695, %v1118_v27  ;;  %v1126_v0 = vmul.f32 1.442695, %v1120_v12  ;;  %vm811_vm2 = vcmp.eq.f32.partialorder %v2024_v14, 0.0  ;;  %v1063_v8 = vadd.f32 %v1059_v48, %v1043_v43  ;;  %v2116_v43 = vld [vmem:[#allocation3 + $0x70] sm:$0xff] }
  0xe3   :  { %v1117_v62 = vpack.c.bf16 %v1115_v36, %v1113_v32  ;;  %v1091_v19 = vsub.f32 %v1090_v41, %v1088_v25  ;;  %v1157_v20 = vperm.slane %v1448_v45, 1  ;;  %v1156_v27 = vperm.slane %v1448_v45, 0 }
  0xe4   :  { %v1500_v17 = vpop.eup %1499  ;;  %1501 = vpow2.f32 %v1122_v44  ;;  %v2120_v12 = vmul.f32 %v1062_v1, %v1852_v46  ;;  %v2131_v25 = vmax.f32 %v831_v38, 0.0  ;;  %v2147_v38 = vld [vmem:[#allocation3 + $0x78] sm:$0xff]  ;;  %vm1352_vm8 = vcmask 1040384  }
  0xe5   :  { %v803_v4 = vmul.f32 %v1500_v17, %v2024_v14  ;;  %1503 = vpow2.f32 %v1126_v0  ;;  %v1119_v55 = vunpack.c.l.bf16 %v1117_v62  ;;  %v1121_v40 = vunpack.c.h.bf16 %v1117_v62 }
  0xe6   :  { %v1092_v32 = vsub.f32 1.0, %v1091_v19  ;;  %vm2136_vm3 = vcmp.eq.s32.totalorder %v1927_v15, %v1156_v27  ;;  %vm2141_vm4 = vcmp.eq.s32.totalorder %v1927_v15, %v1157_v20  ;;  %vm1160_vm5 = vcmp.eq.s32.totalorder %v1934_v26, %v1156_v27 }
  0xe7   :  { %v804_v9 = vmul.f32 %v1500_v17, %v803_v4  ;;  %v1124_v61 = vmul.f32 1.442695, %v1119_v55  ;;  %vm2164_vm9 = vcmp.eq.s32.totalorder %v1934_v26, %v1157_v20  ;;  %v1231_v55 = vmax.f32 %v2145_v49, %v2147_v38 }
  0xe8   :  { %v1179_v1 = vperm.slane %v1092_v32, 0 }
  0xe9   :  { %v805_v10 = vmul.f32 0.5, %v804_v9  ;;  %v1064_v9 = vadd.f32 %v1060_v51, %v1044_v13  ;;  %v1128_v13 = vmul.f32 1.442695, %v1121_v40  ;;  %1505 = vpow2.f32 %v1124_v61 }
  0xea   :  { %v1502_v48 = vpop.eup %1501  ;;  %v1224_v51 = vmax.f32 %v2111_v16, %v2116_v43  ;;  %v1180_v61 = vperm.slane %v1092_v32, 1  ;;  %v1232_v27 = vrot.slane %v1231_v55, 4 }
  0xeb   :  { %v806_v28 = vsub.f32 1.5, %v805_v10  ;;  %v1171_v10 = vadd.s32 1, %v1448_v45  ;;  %v2126_v42 = vmul.f32 %v1064_v9, %v1856_v3  ;;  %1507 = vpow2.f32 %v1128_v13 }
  0xec   :  { %v1225_v62 = vrot.slane %v1224_v51, 4  ;;  %v1233_v32 = vmax.f32 %v1231_v55, %v1232_v27 }
  0xed   :  { %v807_v4 = vmul.f32 %v1500_v17, %v806_v28  ;;  %v2109_v17 = vmul.f32 %v1061_v37, %v1862_v47  ;;  %v2123_v28 = vmul.f32 %v1063_v8, %v1868_v30  ;;  %v1504_v37 = vpop.eup %1503  ;;  %v1163_v30 = vperm.slane %v1091_v19, 0 }
  0xee   :  { %v1130_v36 = vpack.c.bf16 %v1504_v37, %v1502_v48  ;;  %v1173_v59 = vperm.slane %v1171_v10, 1  ;;  %v1164_v8 = vperm.slane %v1091_v19, 1 }
  0xef   :  { %v808_v7 = vmul.f32 %v807_v4, %v2024_v14  ;;  %v1167_v9 = vsel %vm2136_vm3, %v1163_v30, 0.0  ;;  %v1506_v40 = vpop.eup %1505 }
  0xf0   :  { %v1132_v41 = vunpack.c.l.bf16 %v1130_v36  ;;  %v1134_v45 = vunpack.c.h.bf16 %v1130_v36  ;;  %vm2173_vm10 = vcmp.eq.s32.totalorder %v1927_v15, %v1173_v59  ;;  %vm2182_vm11 = vcmp.eq.s32.totalorder %v1934_v26, %v1173_v59 }
  0xf1   :  { %v810_v18 = vsel %vm809_vm1, %v2024_v14, %v808_v7  ;;  %v1172_v14 = vperm.slane %v1171_v10, 0  ;;  %v1508_v20 = vpop.eup %1507  ;;  %v2202_v10 = vadd.f32 %v2126_v42, %v2120_v12 }
  0xf2   :  { %v813_v63 = vsel %vm811_vm2, %v812_v58, %v810_v18  ;;  %v1214_v58 = vmin.f32 %v2131_v25, 14.99  ;;  %v1136_v18 = vadd.f32 %v1134_v45, %v1132_v41  ;;  %v1184_v41 = vsel %vm2173_vm10, %v1180_v61, 0.0 }
  0xf3   :  { %v815_v47 = vmul.f32 %v813_v63, %v2106_v39  ;;  %vm2153_vm6 = vcmp.eq.s32.totalorder %v1927_v15, %v1172_v14  ;;  %vm2158_vm7 = vcmp.eq.s32.totalorder %v1934_v26, %v1172_v14  ;;  %v1226_v63 = vmax.f32 %v1224_v51, %v1225_v62 }
  0xf4   :  { %v1183_v19 = vsel %vm2153_vm6, %v1179_v1, 0.0  ;;  %v1185_v13 = vsel %vm2158_vm7, %v1179_v1, 0.0  ;;  %v1215_v48 = vfloor.f32 %v1214_v58  ;;  %v1137_v37 = vrot.slane %v1136_v18, 4 }
  0xf5   :  { %v816_v46 = vadd.f32 %v815_v47, %v814_v33  ;;  %v1169_v33 = vsel %vm1160_vm5, %v1163_v30, 0.0  ;;  %v1131_v47 = vpack.c.bf16 %v1508_v20, %v1506_v40  ;;  %v1227_v25 = vrot.slane %v1226_v63, 2 }
  0xf6   :  { %v1168_v51 = vsel %vm2141_vm4, %v1164_v8, 0.0  ;;  %v1187_v0 = vadd.f32 %v1183_v19, %v1167_v9  ;;  %v1189_v4 = vadd.f32 %v1185_v13, %v1169_v33  ;;  %v1186_v45 = vsel %vm2182_vm11, %v1180_v61, 0.0 }
  0xf7   :  { %821 = vst.msk [vmem:[#allocation2] ss:$2 sm:$0x3] %vm2094_vm0, %v816_v46  ;;  %v1170_v46 = vsel %vm2164_vm9, %v1164_v8, 0.0  ;;  %v1133_v36 = vunpack.c.l.bf16 %v1131_v47  ;;  %v1135_v44 = vunpack.c.h.bf16 %v1131_v47  ;;  %v1216_v3 = vadd.f32 1.0, %v1215_v48 }
  0xf8   :  { %v1228_v40 = vmax.f32 %v1226_v63, %v1227_v25  ;;  %v1234_v20 = vrot.slane %v1233_v32, 2  ;;  %v2198_v9 = vadd.f32 %v2123_v28, %v2109_v17  ;;  %v1138_v55 = vadd.f32 %v1137_v37, %v1136_v18 }
  0xf9   :  { %v1143_v62 = vadd.f32 %v1135_v44, %v1133_v36  ;;  %v1188_v19 = vadd.f32 %v1184_v41, %v1168_v51  ;;  %v2207_v63 = vadd.f32 %v1015_v35, %v2049_v6  ;;  %v1190_v27 = vadd.f32 %v1186_v45, %v1170_v46 }
  0xfa   :  { %v1229_v61 = vrot.slane %v1228_v40, 1  ;;  %v1235_v47 = vmax.f32 %v1233_v32, %v1234_v20  ;;  %v1191_v17 = vmul.f32 %v1187_v0, %v1929_v21  ;;  %v1193_v28 = vmul.f32 %v1189_v4, %v1931_v2 }
  0xfb   :  { %v1144_v13 = vrot.slane %v1143_v62, 4  ;;  %v1217_v18 = vsub.f32 %v1216_v3, %v1214_v58  ;;  %v1070_v12 = vrot.slane %v2198_v9, 4  ;;  %v1139_v42 = vrot.slane %v1138_v55, 2 }
  0xfc   :  { %v2211_v14 = vmax.f32 %v1228_v40, %v1229_v61  ;;  %v1450_v25 = vcvt.f32.s32 %v1215_v48  ;;  %v1236_v37 = vrot.slane %v1235_v47, 1  ;;  %v1077_v51 = vrot.slane %v2202_v10, 4 }
  0xfd   :  { %v1192_v6 = vmul.f32 %v1188_v19, %v2018_v31  ;;  %v1145_v46 = vadd.f32 %v1144_v13, %v1143_v62  ;;  %v2223_v36 = vadd.f32 %v1193_v28, %v1191_v17  ;;  %v1218_v48 = vsub.f32 1.0, %v1217_v18 }
  0xfe   :  { %v1360_v30 = vld [vmem:[#allocation2] ss:$2 sm:$0x3]  ;;  %v1238_v35 = vsub.f32 %v2111_v16, %v2211_v14  ;;  %v1240_v21 = vsub.f32 %v2116_v43, %v2211_v14  ;;  %v2220_v2 = vmax.f32 %v1235_v47, %v1236_v37  ;;  %v1282_v58 = vperm.slane %v1450_v25, 0 }
  0xff   :  { %v1362_v1 = vperm.slane %v1360_v30, 0  ;;  %v1363_v59 = vperm.slane %v1360_v30, 1  ;;  %v1283_v32 = vperm.slane %v1450_v25, 1  ;;  %v1194_v30 = vmul.f32 %v1190_v27, %v2020_v29 }
 0x100   :  { %v1242_v44 = vpack.c.bf16 %v1240_v21, %v1238_v35  ;;  %v2225_v0 = vadd.f32 %v1139_v42, %v1138_v55  ;;  %v1239_v31 = vsub.f32 %v2145_v49, %v2220_v2  ;;  %v1241_v4 = vsub.f32 %v2147_v38, %v2220_v2 }
 0x101   :  { %v1366_v7 = vsel %vm1352_vm8, %v1362_v1, 0.0  ;;  %v1367_v8 = vsel %vm1352_vm8, %v1363_v59, 0.0  ;;  %v1289_v1 = vperm.slane %v1217_v18, 0  ;;  %v1290_v45 = vperm.slane %v1217_v18, 1 }
 0x102   :  { %v1368_v33 = vadd.f32 %v1367_v8, %v1366_v7  ;;  %v1244_v59 = vunpack.c.l.bf16 %v1242_v44  ;;  %v1246_v41 = vunpack.c.h.bf16 %v1242_v44  ;;  %v1297_v62 = vadd.s32 1, %v1450_v25 }
 0x103   :  { %v1146_v3 = vrot.slane %v1145_v46, 2  ;;  %v1243_v40 = vpack.c.bf16 %v1241_v4, %v1239_v31  ;;  %vm1284_vm12 = vcmp.eq.s32.totalorder %v1927_v15, %v1282_v58  ;;  %vm1285_vm13 = vcmp.eq.s32.totalorder %v1927_v15, %v1283_v32 }
 0x104   :  { %1369 = vadd.xlane.f32.xlu0 %v1368_v33  ;;  %v1248_v29 = vmul.f32 1.442695, %v1244_v59  ;;  %v1252_v20 = vmul.f32 1.442695, %v1246_v41  ;;  %vm1286_vm14 = vcmp.eq.s32.totalorder %v1934_v26, %v1282_v58  ;;  %vm2235_vm15 = vcmp.eq.s32.totalorder %v1934_v26, %v1283_v32 }
 0x105   :  { %v1245_v8 = vunpack.c.l.bf16 %v1243_v40  ;;  %v1247_v55 = vunpack.c.h.bf16 %v1243_v40  ;;  %v1298_v33 = vperm.slane %v1297_v62, 0  ;;  %v1299_v19 = vperm.slane %v1297_v62, 1 }
 0x106   :  { %v1293_v61 = vsel %vm1284_vm12, %v1289_v1, 0.0  ;;  %v1294_v13 = vsel %vm1285_vm13, %v1290_v45, 0.0  ;;  %v1305_v27 = vperm.slane %v1218_v48, 0  ;;  %v1306_v47 = vperm.slane %v1218_v48, 1 }
 0x107   :  { %1509 = vpow2.f32 %v1248_v29  ;;  %v1250_v17 = vmul.f32 1.442695, %v1245_v8  ;;  %v1254_v28 = vmul.f32 1.442695, %v1247_v55  ;;  %v1295_v18 = vsel %vm1286_vm14, %v1289_v1, 0.0 }
 0x108   :  { %1511 = vpow2.f32 %v1252_v20  ;;  %vm1300_vm1 = vcmp.eq.s32.totalorder %v1927_v15, %v1298_v33  ;;  %vm1301_vm2 = vcmp.eq.s32.totalorder %v1927_v15, %v1299_v19  ;;  %vm1302_vm3 = vcmp.eq.s32.totalorder %v1934_v26, %v1298_v33 }
 0x109   :  { %1513 = vpow2.f32 %v1250_v17  ;;  %v1296_v42 = vsel %vm2235_vm15, %v1290_v45, 0.0  ;;  %vm1303_vm4 = vcmp.eq.s32.totalorder %v1934_v26, %v1299_v19  ;;  %v1309_v25 = vsel %vm1300_vm1, %v1305_v27, 0.0 }
 0x10a   :  { %1515 = vpow2.f32 %v1254_v28  ;;  %v1310_v37 = vsel %vm1301_vm2, %v1306_v47, 0.0  ;;  %v1311_v35 = vsel %vm1302_vm3, %v1305_v27, 0.0  ;;  %v1312_v21 = vsel %vm1303_vm4, %v1306_v47, 0.0 }
 0x10b   :  { %v1147_v58 = vadd.f32 %v1146_v3, %v1145_v46  ;;  %v1313_v32 = vadd.f32 %v1309_v25, %v1293_v61  ;;  %v1314_v48 = vadd.f32 %v1310_v37, %v1294_v13  ;;  %v1315_v44 = vadd.f32 %v1311_v35, %v1295_v18 }
 0x10c   :  { %v1071_v31 = vadd.f32 %v1070_v12, %v2198_v9  ;;  %v1141_v15 = vrot.slane %v2225_v0, 1  ;;  %v1202_v4 = vadd.f32 %v1194_v30, %v1192_v6  ;;  %v1316_v1 = vadd.f32 %v1312_v21, %v1296_v42 }
 0x10d   :  { %v1510_v59 = vpop.eup %1509  ;;  %v946_v41 = vrot.slane %v2037_v56, 2  ;;  %v1023_v26 = vadd.f32 %v1022_v23, %v2051_v54  ;;  %v1196_v45 = vrot.slane %v2223_v36, 4  ;;  %v1317_v46 = vmul.f32 %v1313_v32, %v2111_v16 }
 0x10e   :  { %v1512_v62 = vpop.eup %1511  ;;  %v1078_v9 = vadd.f32 %v1077_v51, %v2202_v10  ;;  %v1318_v12 = vmul.f32 %v1314_v48, %v2145_v49  ;;  %v1319_v6 = vmul.f32 %v1315_v44, %v2116_v43  ;;  %v1320_v30 = vmul.f32 %v1316_v1, %v2147_v38 }
 0x10f   :  { %v1514_v3 = vpop.eup %1513  ;;  %v953_v40 = vrot.slane %v2044_v24, 2  ;;  %1517 = vlog2.f32 %v2207_v63  ;;  %v1148_v54 = vrot.slane %v1147_v58, 1  ;;  %v1256_v23 = vpack.c.bf16 %v1512_v62, %v1510_v59 }
 0x110   :  { %v1516_v29 = vpop.eup %1515  ;;  %v1072_v16 = vrot.slane %v1071_v31, 2  ;;  %v1142_v20 = vadd.f32 %v1141_v15, %v2225_v0  ;;  %v1203_v7 = vrot.slane %v1202_v4, 4  ;;  %v1321_v8 = vadd.f32 %v1319_v6, %v1317_v46 }
 0x111   :  { %v1197_v10 = vadd.f32 %v1196_v45, %v2223_v36  ;;  %v1257_v49 = vpack.c.bf16 %v1516_v29, %v1514_v3  ;;  %v1258_v51 = vunpack.c.l.bf16 %v1256_v23  ;;  %v1260_v43 = vunpack.c.h.bf16 %v1256_v23 }
 0x112   :  { %v947_v38 = vadd.f32 %v946_v41, %v2037_v56  ;;  %1519 = vlog2.f32 %v1023_v26  ;;  %v1079_v55 = vrot.slane %v1078_v9, 2  ;;  %v1328_v33 = vadd.f32 %v1320_v30, %v1318_v12 }
 0x113   :  { %v1149_v19 = vadd.f32 %v1148_v54, %v1147_v58  ;;  %v1259_v63 = vunpack.c.l.bf16 %v1257_v49  ;;  %v1261_v61 = vunpack.c.h.bf16 %v1257_v49  ;;  %v1262_v13 = vadd.f32 %v1260_v43, %v1258_v51 }
 0x114   :  { %v1073_v27 = vadd.f32 %v1072_v16, %v1071_v31  ;;  %1521 = vlog2.f32 %v1142_v20  ;;  %v1204_v47 = vadd.f32 %v1203_v7, %v1202_v4  ;;  %v1322_v0 = vrot.slane %v1321_v8, 4 }
 0x115   :  { %v1518_v17 = vpop.eup %1517  ;;  %v1198_v28 = vrot.slane %v1197_v10, 2  ;;  %v1263_v18 = vrot.slane %v1262_v13, 4  ;;  %v1269_v36 = vadd.f32 %v1261_v61, %v1259_v63  ;;  %v896_v42 = vmul.f32 0.6931472, %v2035_v53 }
 0x116   :  { %v948_v25 = vrot.slane %v947_v38, 1  ;;  %v954_v56 = vadd.f32 %v953_v40, %v2044_v24  ;;  %v1329_v37 = vrot.slane %v1328_v33, 4  ;;  %v1080_v35 = vadd.f32 %v1079_v55, %v1078_v9 }
 0x117   :  { %1523 = vlog2.f32 %v1149_v19  ;;  %v1264_v21 = vadd.f32 %v1263_v18, %v1262_v13  ;;  %v1270_v58 = vrot.slane %v1269_v36, 4  ;;  %v1025_v48 = vmul.f32 0.6931472, %v1518_v17 }
 0x118   :  { %v1520_v32 = vpop.eup %1519  ;;  %v1074_v44 = vrot.slane %v1073_v27, 1  ;;  %v1205_v31 = vrot.slane %v1204_v47, 2  ;;  %v1323_v15 = vadd.f32 %v1322_v0, %v1321_v8  ;;  %v898_v4 = vmul.f32 0.6931472, %v2032_v34 }
 0x119   :  { %v1199_v1 = vadd.f32 %v1198_v28, %v1197_v10  ;;  %v1265_v59 = vrot.slane %v1264_v21, 2  ;;  %v1271_v41 = vadd.f32 %v1270_v58, %v1269_v36  ;;  %v899_v53 = vadd.f32 %v896_v42, %v1879_v5 }
 0x11a   :  { %v1522_v26 = vpop.eup %1521  ;;  %v949_v45 = vadd.f32 %v948_v25, %v947_v38  ;;  %v955_v24 = vrot.slane %v954_v56, 1  ;;  %v1330_v46 = vadd.f32 %v1329_v37, %v1328_v33  ;;  %v1027_v62 = vmul.f32 0.6931472, %v1520_v32 }
 0x11b   :  { %v1081_v9 = vrot.slane %v1080_v35, 1  ;;  %v1266_v12 = vadd.f32 %v1265_v59, %v1264_v21  ;;  %v1272_v6 = vrot.slane %v1271_v41, 2  ;;  %v1028_v30 = vadd.f32 %v1025_v48, %v1906_v57 }
 0x11c   :  { %v1075_v3 = vadd.f32 %v1074_v44, %v1073_v27  ;;  %v1206_v40 = vadd.f32 %v1205_v31, %v1204_v47  ;;  %v1324_v54 = vrot.slane %v1323_v15, 2  ;;  %v1151_v34 = vmul.f32 0.6931472, %v1522_v26 }
 0x11d   :  { %v1524_v23 = vpop.eup %1523  ;;  %v1200_v29 = vrot.slane %v1199_v1, 1  ;;  %v1267_v16 = vrot.slane %v1266_v12, 1  ;;  %v1273_v20 = vadd.f32 %v1272_v6, %v1271_v41  ;;  %v900_v7 = vadd.f32 %v898_v4, %v1875_v52 }
 0x11e   :  { %v956_v5 = vadd.f32 %v955_v24, %v954_v56  ;;  %v957_v8 = vsub.f32 %v899_v53, %v949_v45  ;;  %v1331_v10 = vrot.slane %v1330_v46, 2  ;;  %v1029_v49 = vadd.f32 %v1027_v62, %v1904_v11  ;;  %v1340_v24 = vld [vmem:[#allocation2 + $0x1] ss:$2 sm:$0x3] }
 0x11f   :  { %v1082_v51 = vadd.f32 %v1081_v9, %v1080_v35  ;;  %v1268_v43 = vadd.f32 %v1267_v16, %v1266_v12  ;;  %v1274_v38 = vrot.slane %v1273_v20, 1  ;;  %v1083_v55 = vsub.f32 %v1028_v30, %v1075_v3 }
 0x120   :  { %v1153_v57 = vmul.f32 0.6931472, %v1524_v23  ;;  %v1207_v33 = vrot.slane %v1206_v40, 1  ;;  %v1325_v19 = vadd.f32 %v1324_v54, %v1323_v15  ;;  %v1154_v63 = vadd.f32 %v1151_v34, %v2046_v50 }
 0x121   :  { %v1201_v61 = vadd.f32 %v1200_v29, %v1199_v1  ;;  %v1275_v13 = vadd.f32 %v1274_v38, %v1273_v20  ;;  %1525 = vlog2.f32 %v1268_v43  ;;  %v1332_v27 = vadd.f32 %v1331_v10, %v1330_v46 }
 0x122   :  { %v958_v47 = vsub.f32 %v900_v7, %v956_v5  ;;  %v1084_v52 = vsub.f32 %v1029_v49, %v1082_v51  ;;  %v1155_v0 = vadd.f32 %v1153_v57, %v2087_v60  ;;  %v1208_v17 = vadd.f32 %v1207_v33, %v1206_v40 }
 0x123   :  { %1527 = vlog2.f32 %v1275_v13  ;;  %v1326_v11 = vrot.slane %v1325_v19, 1  ;;  %v1085_v28 = vadd.f32 %v1083_v55, %v957_v8  ;;  %v1209_v18 = vsub.f32 %v1154_v63, %v1201_v61 }
 0x124   :  { %v1333_v36 = vrot.slane %v1332_v27, 1  ;;  %v1086_v25 = vadd.f32 %v1084_v52, %v958_v47  ;;  %v1210_v56 = vsub.f32 %v1155_v0, %v1208_v17  ;;  %v1341_v44 = vmul.f32 0.25, %v2106_v39 }
 0x125   :  { %v1327_v35 = vadd.f32 %v1326_v11, %v1325_v19  ;;  %v1211_v21 = vadd.f32 %v1209_v18, %v1085_v28 }
 0x126   :  { %v1334_v48 = vadd.f32 %v1333_v36, %v1332_v27  ;;  %v1212_v31 = vadd.f32 %v1210_v56, %v1086_v25  ;;  %v1343_v59 = vperm.slane %v1341_v44, 0  ;;  %v1344_v41 = vperm.slane %v1341_v44, 1 }
 0x127   :  { %v1526_v42 = vpop.eup %1525 }
 0x128   :  { %v1277_v37 = vmul.f32 0.6931472, %v1526_v42 }
 0x129   :  { %v1528_v50 = vpop.eup %1527 }
 0x12a   :  { %v1279_v58 = vmul.f32 0.6931472, %v1528_v50  ;;  %v1280_v32 = vadd.f32 %v1277_v37, %v2211_v14 }
 0x12c   :  { %v1281_v60 = vadd.f32 %v1279_v58, %v2220_v2  ;;  %v1335_v15 = vsub.f32 %v1280_v32, %v1327_v35 }
 0x12e   :  { %v1336_v4 = vsub.f32 %v1281_v60, %v1334_v48  ;;  %v1337_v1 = vadd.f32 %v1335_v15, %v1211_v21 }
 0x130   :  { %v1338_v26 = vadd.f32 %v1336_v4, %v1212_v31  ;;  %v1347_v53 = vmul.f32 %v1343_v59, %v1337_v1 }
 0x132   :  { %v1348_v45 = vmul.f32 %v1344_v41, %v1338_v26 }
 0x134   :  { %v1351_v46 = vrot.slane %v1348_v45, 7 }
 0x136   :  { %v1353_v62 = vsel %vm1352_vm8, %v1347_v53, %v1351_v46 }
 0x137   :  { %v1355_v9 = vadd.f32 %v1353_v62, %v1340_v24 }
 0x139   :  { %1356 = vst.msk [vmem:[#allocation2 + $0x1] ss:$2 sm:$0x3] %vm2094_vm0, %v1355_v9 }
 0x140   :  { %v1380_v39 = vld [vmem:[#allocation2 + $0x1] ss:$2 sm:$0x3] }
 0x141   :  { %v1382_v14 = vperm.slane %v1380_v39, 0  ;;  %v1383_v12 = vperm.slane %v1380_v39, 1 }
 0x143   :  { %v1386_v2 = vsel %vm1352_vm8, %v1382_v14, 0.0  ;;  %v1387_v6 = vsel %vm1352_vm8, %v1383_v12, 0.0 }
 0x144   :  { %v1388_v30 = vadd.f32 %v1387_v6, %v1386_v2 }
 0x146   :  { %1389 = vadd.xlane.f32.xlu0 %v1388_v30 }
 0x177   :  { %v1370_v3 = vpop.xlane.xlu0 %1369 }
 0x178   :  { %v1371_v40 = vrot.slane %v1370_v3, 4 }
 0x17a   :  { %v1372_v54 = vadd.f32 %v1371_v40, %v1370_v3 }
 0x17c   :  { %v1373_v23 = vrot.slane %v1372_v54, 2 }
 0x17e   :  { %v1374_v34 = vadd.f32 %v1373_v23, %v1372_v54 }
 0x180   :  { %v1375_v29 = vrot.slane %v1374_v34, 1 }
 0x182   :  { %v1376_v16 = vadd.f32 %v1375_v29, %v1374_v34 }
 0x184   :  { %1451 = vpush %v1376_v16 }
 0x1b5   :  { %s1452_s25 = spop %1451 }
 0x1b6   :  { %1379 = sst [smem:[#allocation8]] %s1452_s25 }
 0x1b7   :  { %1408 = dma.smem_to_hbm %s1621_s26, 16, %s1406_s24, [#allocation5]  }
 0x1b9   :  { %v1390_v20 = vpop.xlane.xlu0 %1389 }
 0x1ba   :  { %v1391_v22 = vrot.slane %v1390_v20, 4 }
 0x1bc   :  { %v1392_v7 = vadd.f32 %v1391_v22, %v1390_v20 }
 0x1be   :  { %v1393_v5 = vrot.slane %v1392_v7, 2 }
 0x1c0   :  { %v1394_v8 = vadd.f32 %v1393_v5, %v1392_v7 }
 0x1c2   :  { %v1395_v10 = vrot.slane %v1394_v8, 1 }
 0x1c4   :  { %v1396_v49 = vadd.f32 %v1395_v10, %v1394_v8 }
 0x1c6   :  { %1453 = vpush %v1396_v49 }
 0x1f7   :  { %s1454_s30 = spop %1453 }
 0x1f8   :  { %1399 = sst [smem:[#allocation9]] %s1454_s30 }
 0x1f9   :  { %1417 = dma.smem_to_hbm %s1622_s4, 16, %s1415_s29, [#allocation10]  }
 0x1fa   :  { %1605 = dma.done.wait [#allocation5], 16  }
 0x1fb   :  { %1606 = vsyncadd [#allocation5], 4294967280 }
 0x1fc   :  { %1607 = dma.done.wait [#allocation10], 16  }
 0x1fd   :  { %1608 = vsyncadd [#allocation10], 4294967280 }
 0x1fe   :  { %1426 = sfence }
 0x1ff   :  { %1427 = vsyncpa [#allocation4], 1 }
 0x200   :  { %1428 = vsyncpa [#allocation7], 1 }
 0x201   :  { %1429 = vsyncpa [#allocation5], 1 }
 0x202   :  { %1430 = vsyncpa [#allocation10], 1 }

</bundles_post_ra>
